<compile_context>
chip_gen: v6e
topology: v6e:2x2x1
jax: 0.10.0
libtpu: 0.0.40
codegen_flags: <defaults>
</compile_context>

<pallas_src>
from functools import partial

import jax
import jax.numpy as jnp
from jax.experimental import pallas as pl
from jax.experimental.pallas import tpu as pltpu

EPS = 1e-5


def _round_up(x, m):
    return ((x + m - 1) // m) * m


# ----------------------------------------------------------------------------
# Kernel 1: fused tiled matmul + folded-BN + (optional residual) + (optional ReLU)
#   grid = (M_tiles, K_tiles); output block is resident across the K axis and
#   is used directly as the accumulator (no scratch).
# ----------------------------------------------------------------------------
def _mm_bn_act_kernel(*refs, relu, has_res):
    x_ref, w_ref, scale_ref, shift_ref = refs[:4]
    res_ref = refs[4] if has_res else None
    o_ref = refs[-1]

    k = pl.program_id(1)

    @pl.when(k == 0)
    def _():
        o_ref[...] = jnp.zeros_like(o_ref)

    o_ref[...] += jnp.dot(x_ref[...], w_ref[...],
                          preferred_element_type=jnp.float32)

    @pl.when(k == pl.num_programs(1) - 1)
    def _():
        y = o_ref[...] * scale_ref[...] + shift_ref[...]
        if has_res:
            y = y + res_ref[...]
        if relu:
            y = jnp.maximum(y, 0.0)
        o_ref[...] = y.astype(o_ref.dtype)


def matmul_bn_act(x, w, scale, shift, residual=None, relu=True, tm=256, tk=512):
    """x: (M, K) , w: (K, N), scale/shift: (N,), residual: (M, N) -> (M, N) f32."""
    M, K = x.shape
    Kw, Nout = w.shape
    assert K == Kw

    # --- M tiling (parallel axis) ---
    Mp = _round_up(M, 8)
    tm_eff = min(tm, Mp)
    Mp = _round_up(Mp, tm_eff)

    # --- K tiling (reduction axis). Full-K block when it fits (no grid overhead) ---
    if K <= tk:
        tk_eff, Kp = K, K
    else:
        tk_eff, Kp = tk, _round_up(K, tk)

    xb = x
    if (Mp != M) or (Kp != K):
        xb = jnp.pad(x, ((0, Mp - M), (0, Kp - K)))
    wb = w if Kp == K else jnp.pad(w, ((0, Kp - K), (0, 0)))

    # bf16 operands for the MXU; accumulation stays f32.
    xb = xb.astype(jnp.bfloat16)
    wb = wb.astype(jnp.bfloat16)

    has_res = residual is not None
    res = None
    if has_res:
        res = residual.astype(jnp.float32)
        if Mp != M:
            res = jnp.pad(res, ((0, Mp - M), (0, 0)))

    in_specs = [
        pl.BlockSpec((tm_eff, tk_eff), lambda m, k: (m, k)),
        pl.BlockSpec((tk_eff, Nout), lambda m, k: (k, 0)),
        pl.BlockSpec((1, Nout), lambda m, k: (0, 0)),
        pl.BlockSpec((1, Nout), lambda m, k: (0, 0)),
    ]
    args = [xb, wb,
            scale.reshape(1, Nout).astype(jnp.float32),
            shift.reshape(1, Nout).astype(jnp.float32)]
    if has_res:
        in_specs.append(pl.BlockSpec((tm_eff, Nout), lambda m, k: (m, 0)))
        args.append(res)

    out = pl.pallas_call(
        partial(_mm_bn_act_kernel, relu=relu, has_res=has_res),
        out_shape=jax.ShapeDtypeStruct((Mp, Nout), jnp.float32),
        grid_spec=pltpu.PrefetchScalarGridSpec(
            num_scalar_prefetch=0,
            grid=(Mp // tm_eff, Kp // tk_eff),
            in_specs=in_specs,
            out_specs=pl.BlockSpec((tm_eff, Nout), lambda m, k: (m, 0)),
        ),
        compiler_params=pltpu.CompilerParams(
            dimension_semantics=("parallel", "arbitrary")),
    )(*args)
    return out[:M]


# ----------------------------------------------------------------------------
# Kernel 2: dilated 3x3 conv with implicit im2col + folded BN + ReLU
#   grid = (N, H, kh); per step we load one dilation-shifted padded input row,
#   do the three kw-tap matmuls with static slices, and accumulate into the
#   resident per-row output block.  BN + ReLU run in place on the last tap.
# ----------------------------------------------------------------------------
def _conv3x3_row_kernel(xp_ref, w_ref, scale_ref, shift_ref, o_ref, *, dil):
    kh = pl.program_id(2)
    w_out = o_ref.shape[2]
    c_out = o_ref.shape[3]

    @pl.when(kh == 0)
    def _():
        o_ref[...] = jnp.zeros_like(o_ref)

    acc = jnp.zeros((w_out, c_out), jnp.float32)
    for kw in range(3):  # static taps -> static sublane slices, unrolled
        xs = xp_ref[0, 0, kw * dil:kw * dil + w_out, :]          # (W, Cin)
        acc += jnp.dot(xs, w_ref[0, kw],
                       preferred_element_type=jnp.float32)        # (W, Cout)
    o_ref[0, 0] += acc

    @pl.when(kh == pl.num_programs(2) - 1)
    def _():
        y = o_ref[0, 0] * scale_ref[...] + shift_ref[...]
        o_ref[0, 0] = jnp.maximum(y, 0.0).astype(o_ref.dtype)


def conv3x3_bn_relu(x_nhwc, w_oihw, scale, shift, dilation):
    """x: (N,H,W,Cin) NHWC; w: (Cout,Cin,3,3) torch layout -> (N,H,W,Cout)."""
    n, h, w, c_in = x_nhwc.shape
    c_out = w_oihw.shape[0]
    d = int(dilation)

    xp = jnp.pad(x_nhwc, ((0, 0), (d, d), (d, d), (0, 0))).astype(jnp.bfloat16)
    wt = jnp.transpose(w_oihw, (2, 3, 1, 0)).astype(jnp.bfloat16)  # (3,3,Cin,Cout)
    wp = w + 2 * d

    return pl.pallas_call(
        partial(_conv3x3_row_kernel, dil=d),
        out_shape=jax.ShapeDtypeStruct((n, h, w, c_out), jnp.float32),
        grid_spec=pltpu.PrefetchScalarGridSpec(
            num_scalar_prefetch=0,
            grid=(n, h, 3),
            in_specs=[
                # dilation-shifted padded input row (implicit im2col)
                pl.BlockSpec((1, 1, wp, c_in),
                             lambda b, r, kh: (b, r + kh * d, 0, 0)),
                pl.BlockSpec((1, 3, c_in, c_out),
                             lambda b, r, kh: (kh, 0, 0, 0)),
                pl.BlockSpec((1, c_out), lambda b, r, kh: (0, 0)),
                pl.BlockSpec((1, c_out), lambda b, r, kh: (0, 0)),
            ],
            out_specs=pl.BlockSpec((1, 1, w, c_out),
                                   lambda b, r, kh: (b, r, 0, 0)),
        ),
        compiler_params=pltpu.CompilerParams(
            dimension_semantics=("parallel", "parallel", "arbitrary")),
    )(xp, wt,
      scale.reshape(1, c_out).astype(jnp.float32),
      shift.reshape(1, c_out).astype(jnp.float32))


# ----------------------------------------------------------------------------
# BatchNorm folding (inference mode)
# ----------------------------------------------------------------------------
def bn_fold(gamma, beta, mean, var):
    scale = gamma / jnp.sqrt(var + EPS)
    shift = beta - mean * scale
    return scale.astype(jnp.float32), shift.astype(jnp.float32)


# ----------------------------------------------------------------------------
# Parameters (mirroring PyTorch __init__ shapes; BN at deterministic init)
# ----------------------------------------------------------------------------
def init_params(key, inplanes, planes):
    expansion = 4
    k1, k2, k3 = jax.random.split(key, 3)

    def bn(c):
        return dict(gamma=jnp.ones((c,), jnp.float32),
                    beta=jnp.zeros((c,), jnp.float32),
                    mean=jnp.zeros((c,), jnp.float32),
                    var=jnp.ones((c,), jnp.float32))

    return {
        "conv1_w": 0.05 * jax.random.normal(k1, (planes, inplanes, 1, 1), jnp.float32),
        "conv2_w": 0.05 * jax.random.normal(k2, (planes, planes, 3, 3), jnp.float32),
        "conv3_w": 0.05 * jax.random.normal(k3, (planes * expansion, planes, 1, 1),
                                            jnp.float32),
        "bn1": bn(planes),
        "bn2": bn(planes),
        "bn3": bn(planes * expansion),
    }


# ----------------------------------------------------------------------------
# Bottleneck forward
# ----------------------------------------------------------------------------
@partial(jax.jit, static_argnames=("stride", "dilation"))
def bottleneck_forward(p, x_nchw, *, stride=1, dilation=1):
    n, c_in, h, w = x_nchw.shape
    planes = p["conv1_w"].shape[0]
    c_out = p["conv3_w"].shape[0]

    # downsample is None -> identity residual; requires matching shapes.
    assert stride == 1 and c_in == c_out, \
        "identity residual requires stride=1 and inplanes == planes*4"

    x = jnp.transpose(x_nchw, (0, 2, 3, 1))                    # NHWC, once

    # conv1 (1x1, stride) -> bn1 -> relu
    xs = x[:, ::stride, ::stride, :]
    nb, ho, wo, _ = xs.shape
    s1, b1 = bn_fold(**p["bn1"])
    out = matmul_bn_act(xs.reshape(nb * ho * wo, c_in),
                        p["conv1_w"].reshape(planes, c_in).T,
                        s1, b1, relu=True)
    out = out.reshape(nb, ho, wo, planes)

    # conv2 (3x3, dilated, padding=dilation) -> bn2 -> relu   (implicit im2col)
    s2, b2 = bn_fold(**p["bn2"])
    out = conv3x3_bn_relu(out, p["conv2_w"], s2, b2, dilation)

    # conv3 (1x1) -> bn3 -> (+ residual) -> relu   (all fused in one epilogue)
    s3, b3 = bn_fold(**p["bn3"])
    out = matmul_bn_act(out.reshape(nb * ho * wo, planes),
                        p["conv3_w"].reshape(c_out, planes).T,
                        s3, b3,
                        residual=x.reshape(n * h * w, c_in),
                        relu=True)
    out = out.reshape(n, h, w, c_out)

    return jnp.transpose(out, (0, 3, 1, 2))                    # back to NCHW, once


if __name__ == "__main__":
    # Small test shapes consistent with the module:
    #   inplanes = planes * expansion so the identity residual applies.
    #   Final output / residual path is 128 channels (lane-dense stores).
    batch, inplanes, spatial = 2, 128, 16
    planes = 32
    dilation = 2
    stride = 1

    key = jax.random.PRNGKey(0)
    kx, kp = jax.random.split(key)
    x = jax.random.normal(kx, (batch, inplanes, spatial, spatial), jnp.float32)
    params = init_params(kp, inplanes, planes)

    out = bottleneck_forward(params, x, stride=stride, dilation=dilation)
    out = jax.block_until_ready(out)

    assert out.shape == (batch, planes * 4, spatial, spatial), out.shape
    assert out.dtype == jnp.float32
    assert bool(jnp.all(jnp.isfinite(out)))
    assert bool(jnp.all(out >= 0.0))          # final ReLU
    print("KERNEL_OK")
</pallas_src>

<mosaic_0001>
module attributes {stable_mosaic.version = 11 : i64} {
  func.func @_mm_bn_act_kernel(%arg0: i32, %arg1: i32, %arg2: memref<256x128xbf16, #tpu.memory_space<vmem>>, %arg3: memref<128x32xbf16, #tpu.memory_space<vmem>>, %arg4: memref<1x32xf32, #tpu.memory_space<vmem>>, %arg5: memref<1x32xf32, #tpu.memory_space<vmem>>, %arg6: memref<256x32xf32, #tpu.memory_space<vmem>>) attributes {dimension_semantics = [#tpu.dimension_semantics<parallel>, #tpu.dimension_semantics<arbitrary>], iteration_bounds = array<i64: 2, 1>, scalar_prefetch = 0 : i64, scratch_operands = 0 : i64, tpu.core_type = #tpu.core_type<tc>, window_params = [{transform_indices = @transform_0, window_bounds = array<i64: 256, 128>}, {transform_indices = @transform_1, window_bounds = array<i64: 128, 32>}, {pipeline_mode = #tpu.pipeline_mode<synchronous>, transform_indices = @transform_2, window_bounds = array<i64: 1, 32>}, {pipeline_mode = #tpu.pipeline_mode<synchronous>, transform_indices = @transform_3, window_bounds = array<i64: 1, 32>}, {transform_indices = @transform_4, window_bounds = array<i64: 256, 32>}]} {
    %c0_i32 = arith.constant 0 : i32
    %0 = arith.cmpi eq, %arg1, %c0_i32 : i32
    %1 = arith.extui %0 : i1 to i32
    %c0_i32_0 = arith.constant 0 : i32
    %2 = arith.cmpi ne, %1, %c0_i32_0 : i32
    scf.if %2 {
      %cst_10 = arith.constant 0.000000e+00 : f32
      %12 = vector.broadcast %cst_10 : f32 to vector<256x32xf32>
      %c0_11 = arith.constant 0 : index
      %c0_12 = arith.constant 0 : index
      %13 = vector.load %arg6[%c0_11, %c0_12] : memref<256x32xf32, #tpu.memory_space<vmem>>, vector<256x32xf32>
      tpu.vector_store %arg6[%c0_11, %c0_12], %12 {strides = array<i32>} : memref<256x32xf32, #tpu.memory_space<vmem>>, vector<256x32xf32>,
    } else {
    }
    %c0 = arith.constant 0 : index
    %c0_1 = arith.constant 0 : index
    %3 = vector.load %arg6[%c0, %c0_1] : memref<256x32xf32, #tpu.memory_space<vmem>>, vector<256x32xf32>
    %c0_2 = arith.constant 0 : index
    %c0_3 = arith.constant 0 : index
    %4 = vector.load %arg2[%c0_2, %c0_3] : memref<256x128xbf16, #tpu.memory_space<vmem>>, vector<256x128xbf16>
    %c0_4 = arith.constant 0 : index
    %c0_5 = arith.constant 0 : index
    %5 = vector.load %arg3[%c0_4, %c0_5] : memref<128x32xbf16, #tpu.memory_space<vmem>>, vector<128x32xbf16>
    %cst = arith.constant dense<0.000000e+00> : vector<256x32xf32>
    %6 = tpu.matmul %4, %5, %cst {dimension_numbers = #tpu.dot_dimension_numbers<[1], [0], [0], [1], [0, 0, 1, 1], [], []>} : vector<256x128xbf16>, vector<128x32xbf16>, vector<256x32xf32> -> vector<256x32xf32>
    %7 = arith.addf %3, %6 : vector<256x32xf32>
    %c0_6 = arith.constant 0 : index
    %c0_7 = arith.constant 0 : index
    %8 = vector.load %arg6[%c0_6, %c0_7] : memref<256x32xf32, #tpu.memory_space<vmem>>, vector<256x32xf32>
    tpu.vector_store %arg6[%c0_6, %c0_7], %7 {strides = array<i32>} : memref<256x32xf32, #tpu.memory_space<vmem>>, vector<256x32xf32>,
    %c0_i32_8 = arith.constant 0 : i32
    %9 = arith.cmpi eq, %arg1, %c0_i32_8 : i32
    %10 = arith.extui %9 : i1 to i32
    %c0_i32_9 = arith.constant 0 : i32
    %11 = arith.cmpi ne, %10, %c0_i32_9 : i32
    scf.if %11 {
      %c0_10 = arith.constant 0 : index
      %c0_11 = arith.constant 0 : index
      %12 = vector.load %arg6[%c0_10, %c0_11] : memref<256x32xf32, #tpu.memory_space<vmem>>, vector<256x32xf32>
      %c0_12 = arith.constant 0 : index
      %c0_13 = arith.constant 0 : index
      %13 = vector.load %arg4[%c0_12, %c0_13] : memref<1x32xf32, #tpu.memory_space<vmem>>, vector<1x32xf32>
      %14 = vector.broadcast %13 : vector<1x32xf32> to vector<256x32xf32>
      %15 = arith.mulf %12, %14 : vector<256x32xf32>
      %c0_14 = arith.constant 0 : index
      %c0_15 = arith.constant 0 : index
      %16 = vector.load %arg5[%c0_14, %c0_15] : memref<1x32xf32, #tpu.memory_space<vmem>>, vector<1x32xf32>
      %17 = vector.broadcast %16 : vector<1x32xf32> to vector<256x32xf32>
      %18 = arith.addf %15, %17 : vector<256x32xf32>
      %cst_16 = arith.constant 0.000000e+00 : f32
      %19 = vector.broadcast %cst_16 : f32 to vector<256x32xf32>
      %20 = arith.maximumf %18, %19 : vector<256x32xf32>
      %c0_17 = arith.constant 0 : index
      %c0_18 = arith.constant 0 : index
      %21 = vector.load %arg6[%c0_17, %c0_18] : memref<256x32xf32, #tpu.memory_space<vmem>>, vector<256x32xf32>
      tpu.vector_store %arg6[%c0_17, %c0_18], %20 {strides = array<i32>} : memref<256x32xf32, #tpu.memory_space<vmem>>, vector<256x32xf32>,
    } else {
    }
    return
  }
  func.func @transform_0(%arg0: i32, %arg1: i32) -> (i32, i32) {
    %c0_i32 = arith.constant 0 : i32
    return %arg0, %arg1 : i32, i32
  }
  func.func @transform_1(%arg0: i32, %arg1: i32) -> (i32, i32) {
    %c0_i32 = arith.constant 0 : i32
    %c0_i32_0 = arith.constant 0 : i32
    return %arg1, %c0_i32 : i32, i32
  }
  func.func @transform_2(%arg0: i32, %arg1: i32) -> (i32, i32) {
    %c0_i32 = arith.constant 0 : i32
    %c0_i32_0 = arith.constant 0 : i32
    %c0_i32_1 = arith.constant 0 : i32
    return %c0_i32, %c0_i32_0 : i32, i32
  }
  func.func @transform_3(%arg0: i32, %arg1: i32) -> (i32, i32) {
    %c0_i32 = arith.constant 0 : i32
    %c0_i32_0 = arith.constant 0 : i32
    %c0_i32_1 = arith.constant 0 : i32
    return %c0_i32, %c0_i32_0 : i32, i32
  }
  func.func @transform_4(%arg0: i32, %arg1: i32) -> (i32, i32) {
    %c0_i32 = arith.constant 0 : i32
    %c0_i32_0 = arith.constant 0 : i32
    return %arg0, %c0_i32 : i32, i32
  }
}

module attributes {stable_mosaic.version = 11 : i64} {
  func.func @_conv3x3_row_kernel(%arg0: i32, %arg1: i32, %arg2: i32, %arg3: memref<1x1x20x32xbf16, #tpu.memory_space<vmem>>, %arg4: memref<1x3x32x32xbf16, #tpu.memory_space<vmem>>, %arg5: memref<1x32xf32, #tpu.memory_space<vmem>>, %arg6: memref<1x32xf32, #tpu.memory_space<vmem>>, %arg7: memref<1x1x16x32xf32, #tpu.memory_space<vmem>>) attributes {dimension_semantics = [#tpu.dimension_semantics<parallel>, #tpu.dimension_semantics<parallel>, #tpu.dimension_semantics<arbitrary>], iteration_bounds = array<i64: 2, 16, 3>, scalar_prefetch = 0 : i64, scratch_operands = 0 : i64, tpu.core_type = #tpu.core_type<tc>, window_params = [{transform_indices = @transform_0, window_bounds = array<i64: 1, 1, 20, 32>}, {transform_indices = @transform_1, window_bounds = array<i64: 1, 3, 32, 32>}, {pipeline_mode = #tpu.pipeline_mode<synchronous>, transform_indices = @transform_2, window_bounds = array<i64: 1, 32>}, {pipeline_mode = #tpu.pipeline_mode<synchronous>, transform_indices = @transform_3, window_bounds = array<i64: 1, 32>}, {transform_indices = @transform_4, window_bounds = array<i64: 1, 1, 16, 32>}]} {
    %c0_i32 = arith.constant 0 : i32
    %0 = arith.cmpi eq, %arg2, %c0_i32 : i32
    %1 = arith.extui %0 : i1 to i32
    %c0_i32_0 = arith.constant 0 : i32
    %2 = arith.cmpi ne, %1, %c0_i32_0 : i32
    scf.if %2 {
      %cst_33 = arith.constant 0.000000e+00 : f32
      %31 = vector.broadcast %cst_33 : f32 to vector<1x1x16x32xf32>
      %c0_34 = arith.constant 0 : index
      %c0_35 = arith.constant 0 : index
      %c0_36 = arith.constant 0 : index
      %c0_37 = arith.constant 0 : index
      %32 = vector.load %arg7[%c0_34, %c0_35, %c0_36, %c0_37] : memref<1x1x16x32xf32, #tpu.memory_space<vmem>>, vector<1x1x16x32xf32>
      tpu.vector_store %arg7[%c0_34, %c0_35, %c0_36, %c0_37], %31 {strides = array<i32>} : memref<1x1x16x32xf32, #tpu.memory_space<vmem>>, vector<1x1x16x32xf32>,
    } else {
    }
    %cst = arith.constant 0.000000e+00 : f32
    %3 = vector.broadcast %cst : f32 to vector<16x32xf32>
    %c0 = arith.constant 0 : index
    %c0_1 = arith.constant 0 : index
    %c0_2 = arith.constant 0 : index
    %c0_3 = arith.constant 0 : index
    %4 = vector.load %arg3[%c0, %c0_1, %c0_2, %c0_3] : memref<1x1x20x32xbf16, #tpu.memory_space<vmem>>, vector<1x1x16x32xbf16>
    %5 = vector.shape_cast %4 : vector<1x1x16x32xbf16> to vector<16x32xbf16>
    %c0_4 = arith.constant 0 : index
    %c0_5 = arith.constant 0 : index
    %c0_6 = arith.constant 0 : index
    %c0_7 = arith.constant 0 : index
    %6 = vector.load %arg4[%c0_4, %c0_5, %c0_6, %c0_7] : memref<1x3x32x32xbf16, #tpu.memory_space<vmem>>, vector<1x1x32x32xbf16>
    %7 = vector.shape_cast %6 : vector<1x1x32x32xbf16> to vector<32x32xbf16>
    %cst_8 = arith.constant dense<0.000000e+00> : vector<16x32xf32>
    %8 = tpu.matmul %5, %7, %cst_8 {dimension_numbers = #tpu.dot_dimension_numbers<[1], [0], [0], [1], [0, 0, 1, 1], [], []>} : vector<16x32xbf16>, vector<32x32xbf16>, vector<16x32xf32> -> vector<16x32xf32>
    %9 = arith.addf %3, %8 : vector<16x32xf32>
    %c0_9 = arith.constant 0 : index
    %c0_10 = arith.constant 0 : index
    %c2 = arith.constant 2 : index
    %c0_11 = arith.constant 0 : index
    %10 = vector.load %arg3[%c0_9, %c0_10, %c2, %c0_11] : memref<1x1x20x32xbf16, #tpu.memory_space<vmem>>, vector<1x1x16x32xbf16>
    %11 = vector.shape_cast %10 : vector<1x1x16x32xbf16> to vector<16x32xbf16>
    %c0_12 = arith.constant 0 : index
    %c1 = arith.constant 1 : index
    %c0_13 = arith.constant 0 : index
    %c0_14 = arith.constant 0 : index
    %12 = vector.load %arg4[%c0_12, %c1, %c0_13, %c0_14] : memref<1x3x32x32xbf16, #tpu.memory_space<vmem>>, vector<1x1x32x32xbf16>
    %13 = vector.shape_cast %12 : vector<1x1x32x32xbf16> to vector<32x32xbf16>
    %cst_15 = arith.constant dense<0.000000e+00> : vector<16x32xf32>
    %14 = tpu.matmul %11, %13, %cst_15 {dimension_numbers = #tpu.dot_dimension_numbers<[1], [0], [0], [1], [0, 0, 1, 1], [], []>} : vector<16x32xbf16>, vector<32x32xbf16>, vector<16x32xf32> -> vector<16x32xf32>
    %15 = arith.addf %9, %14 : vector<16x32xf32>
    %c0_16 = arith.constant 0 : index
    %c0_17 = arith.constant 0 : index
    %c4 = arith.constant 4 : index
    %c0_18 = arith.constant 0 : index
    %16 = vector.load %arg3[%c0_16, %c0_17, %c4, %c0_18] : memref<1x1x20x32xbf16, #tpu.memory_space<vmem>>, vector<1x1x16x32xbf16>
    %17 = vector.shape_cast %16 : vector<1x1x16x32xbf16> to vector<16x32xbf16>
    %c0_19 = arith.constant 0 : index
    %c2_20 = arith.constant 2 : index
    %c0_21 = arith.constant 0 : index
    %c0_22 = arith.constant 0 : index
    %18 = vector.load %arg4[%c0_19, %c2_20, %c0_21, %c0_22] : memref<1x3x32x32xbf16, #tpu.memory_space<vmem>>, vector<1x1x32x32xbf16>
    %19 = vector.shape_cast %18 : vector<1x1x32x32xbf16> to vector<32x32xbf16>
    %cst_23 = arith.constant dense<0.000000e+00> : vector<16x32xf32>
    %20 = tpu.matmul %17, %19, %cst_23 {dimension_numbers = #tpu.dot_dimension_numbers<[1], [0], [0], [1], [0, 0, 1, 1], [], []>} : vector<16x32xbf16>, vector<32x32xbf16>, vector<16x32xf32> -> vector<16x32xf32>
    %21 = arith.addf %15, %20 : vector<16x32xf32>
    %c0_24 = arith.constant 0 : index
    %c0_25 = arith.constant 0 : index
    %c0_26 = arith.constant 0 : index
    %c0_27 = arith.constant 0 : index
    %22 = vector.load %arg7[%c0_24, %c0_25, %c0_26, %c0_27] : memref<1x1x16x32xf32, #tpu.memory_space<vmem>>, vector<1x1x16x32xf32>
    %23 = vector.shape_cast %22 : vector<1x1x16x32xf32> to vector<16x32xf32>
    %24 = arith.addf %23, %21 : vector<16x32xf32>
    %c0_28 = arith.constant 0 : index
    %c0_29 = arith.constant 0 : index
    %c0_30 = arith.constant 0 : index
    %c0_31 = arith.constant 0 : index
    %25 = vector.load %arg7[%c0_28, %c0_29, %c0_30, %c0_31] : memref<1x1x16x32xf32, #tpu.memory_space<vmem>>, vector<1x1x16x32xf32>
    %26 = vector.shape_cast %25 : vector<1x1x16x32xf32> to vector<16x32xf32>
    %27 = vector.shape_cast %24 : vector<16x32xf32> to vector<1x1x16x32xf32>
    tpu.vector_store %arg7[%c0_28, %c0_29, %c0_30, %c0_31], %27 {strides = array<i32>} : memref<1x1x16x32xf32, #tpu.memory_space<vmem>>, vector<1x1x16x32xf32>,
    %c2_i32 = arith.constant 2 : i32
    %28 = arith.cmpi eq, %arg2, %c2_i32 : i32
    %29 = arith.extui %28 : i1 to i32
    %c0_i32_32 = arith.constant 0 : i32
    %30 = arith.cmpi ne, %29, %c0_i32_32 : i32
    scf.if %30 {
      %c0_33 = arith.constant 0 : index
      %c0_34 = arith.constant 0 : index
      %c0_35 = arith.constant 0 : index
      %c0_36 = arith.constant 0 : index
      %31 = vector.load %arg7[%c0_33, %c0_34, %c0_35, %c0_36] : memref<1x1x16x32xf32, #tpu.memory_space<vmem>>, vector<1x1x16x32xf32>
      %32 = vector.shape_cast %31 : vector<1x1x16x32xf32> to vector<16x32xf32>
      %c0_37 = arith.constant 0 : index
      %c0_38 = arith.constant 0 : index
      %33 = vector.load %arg5[%c0_37, %c0_38] : memref<1x32xf32, #tpu.memory_space<vmem>>, vector<1x32xf32>
      %34 = vector.broadcast %33 : vector<1x32xf32> to vector<16x32xf32>
      %35 = arith.mulf %32, %34 : vector<16x32xf32>
      %c0_39 = arith.constant 0 : index
      %c0_40 = arith.constant 0 : index
      %36 = vector.load %arg6[%c0_39, %c0_40] : memref<1x32xf32, #tpu.memory_space<vmem>>, vector<1x32xf32>
      %37 = vector.broadcast %36 : vector<1x32xf32> to vector<16x32xf32>
      %38 = arith.addf %35, %37 : vector<16x32xf32>
      %cst_41 = arith.constant 0.000000e+00 : f32
      %39 = vector.broadcast %cst_41 : f32 to vector<16x32xf32>
      %40 = arith.maximumf %38, %39 : vector<16x32xf32>
      %c0_42 = arith.constant 0 : index
      %c0_43 = arith.constant 0 : index
      %c0_44 = arith.constant 0 : index
      %c0_45 = arith.constant 0 : index
      %41 = vector.load %arg7[%c0_42, %c0_43, %c0_44, %c0_45] : memref<1x1x16x32xf32, #tpu.memory_space<vmem>>, vector<1x1x16x32xf32>
      %42 = vector.shape_cast %41 : vector<1x1x16x32xf32> to vector<16x32xf32>
      %43 = vector.shape_cast %40 : vector<16x32xf32> to vector<1x1x16x32xf32>
      tpu.vector_store %arg7[%c0_42, %c0_43, %c0_44, %c0_45], %43 {strides = array<i32>} : memref<1x1x16x32xf32, #tpu.memory_space<vmem>>, vector<1x1x16x32xf32>,
    } else {
    }
    return
  }
  func.func @transform_0(%arg0: i32, %arg1: i32, %arg2: i32) -> (i32, i32, i32, i32) {
    %c2_i32 = arith.constant 2 : i32
    %0 = arith.muli %arg2, %c2_i32 : i32
    %1 = arith.addi %arg1, %0 : i32
    %c0_i32 = arith.constant 0 : i32
    %c0_i32_0 = arith.constant 0 : i32
    %c0_i32_1 = arith.constant 0 : i32
    return %arg0, %1, %c0_i32, %c0_i32_0 : i32, i32, i32, i32
  }
  func.func @transform_1(%arg0: i32, %arg1: i32, %arg2: i32) -> (i32, i32, i32, i32) {
    %c0_i32 = arith.constant 0 : i32
    %c0_i32_0 = arith.constant 0 : i32
    %c0_i32_1 = arith.constant 0 : i32
    %c0_i32_2 = arith.constant 0 : i32
    return %arg2, %c0_i32, %c0_i32_0, %c0_i32_1 : i32, i32, i32, i32
  }
  func.func @transform_2(%arg0: i32, %arg1: i32, %arg2: i32) -> (i32, i32) {
    %c0_i32 = arith.constant 0 : i32
    %c0_i32_0 = arith.constant 0 : i32
    %c0_i32_1 = arith.constant 0 : i32
    return %c0_i32, %c0_i32_0 : i32, i32
  }
  func.func @transform_3(%arg0: i32, %arg1: i32, %arg2: i32) -> (i32, i32) {
    %c0_i32 = arith.constant 0 : i32
    %c0_i32_0 = arith.constant 0 : i32
    %c0_i32_1 = arith.constant 0 : i32
    return %c0_i32, %c0_i32_0 : i32, i32
  }
  func.func @transform_4(%arg0: i32, %arg1: i32, %arg2: i32) -> (i32, i32, i32, i32) {
    %c0_i32 = arith.constant 0 : i32
    %c0_i32_0 = arith.constant 0 : i32
    %c0_i32_1 = arith.constant 0 : i32
    return %arg0, %arg1, %c0_i32, %c0_i32_0 : i32, i32, i32, i32
  }
}

module attributes {stable_mosaic.version = 11 : i64} {
  func.func @_mm_bn_act_kernel(%arg0: i32, %arg1: i32, %arg2: memref<256x32xbf16, #tpu.memory_space<vmem>>, %arg3: memref<32x128xbf16, #tpu.memory_space<vmem>>, %arg4: memref<1x128xf32, #tpu.memory_space<vmem>>, %arg5: memref<1x128xf32, #tpu.memory_space<vmem>>, %arg6: memref<256x128xf32, #tpu.memory_space<vmem>>, %arg7: memref<256x128xf32, #tpu.memory_space<vmem>>) attributes {dimension_semantics = [#tpu.dimension_semantics<parallel>, #tpu.dimension_semantics<arbitrary>], iteration_bounds = array<i64: 2, 1>, scalar_prefetch = 0 : i64, scratch_operands = 0 : i64, tpu.core_type = #tpu.core_type<tc>, window_params = [{transform_indices = @transform_0, window_bounds = array<i64: 256, 32>}, {transform_indices = @transform_1, window_bounds = array<i64: 32, 128>}, {pipeline_mode = #tpu.pipeline_mode<synchronous>, transform_indices = @transform_2, window_bounds = array<i64: 1, 128>}, {pipeline_mode = #tpu.pipeline_mode<synchronous>, transform_indices = @transform_3, window_bounds = array<i64: 1, 128>}, {transform_indices = @transform_4, window_bounds = array<i64: 256, 128>}, {transform_indices = @transform_5, window_bounds = array<i64: 256, 128>}]} {
    %c0_i32 = arith.constant 0 : i32
    %0 = arith.cmpi eq, %arg1, %c0_i32 : i32
    %1 = arith.extui %0 : i1 to i32
    %c0_i32_0 = arith.constant 0 : i32
    %2 = arith.cmpi ne, %1, %c0_i32_0 : i32
    scf.if %2 {
      %cst_10 = arith.constant 0.000000e+00 : f32
      %12 = vector.broadcast %cst_10 : f32 to vector<256x128xf32>
      %c0_11 = arith.constant 0 : index
      %c0_12 = arith.constant 0 : index
      %13 = vector.load %arg7[%c0_11, %c0_12] : memref<256x128xf32, #tpu.memory_space<vmem>>, vector<256x128xf32>
      tpu.vector_store %arg7[%c0_11, %c0_12], %12 {strides = array<i32>} : memref<256x128xf32, #tpu.memory_space<vmem>>, vector<256x128xf32>,
    } else {
    }
    %c0 = arith.constant 0 : index
    %c0_1 = arith.constant 0 : index
    %3 = vector.load %arg7[%c0, %c0_1] : memref<256x128xf32, #tpu.memory_space<vmem>>, vector<256x128xf32>
    %c0_2 = arith.constant 0 : index
    %c0_3 = arith.constant 0 : index
    %4 = vector.load %arg2[%c0_2, %c0_3] : memref<256x32xbf16, #tpu.memory_space<vmem>>, vector<256x32xbf16>
    %c0_4 = arith.constant 0 : index
    %c0_5 = arith.constant 0 : index
    %5 = vector.load %arg3[%c0_4, %c0_5] : memref<32x128xbf16, #tpu.memory_space<vmem>>, vector<32x128xbf16>
    %cst = arith.constant dense<0.000000e+00> : vector<256x128xf32>
    %6 = tpu.matmul %4, %5, %cst {dimension_numbers = #tpu.dot_dimension_numbers<[1], [0], [0], [1], [0, 0, 1, 1], [], []>} : vector<256x32xbf16>, vector<32x128xbf16>, vector<256x128xf32> -> vector<256x128xf32>
    %7 = arith.addf %3, %6 : vector<256x128xf32>
    %c0_6 = arith.constant 0 : index
    %c0_7 = arith.constant 0 : index
    %8 = vector.load %arg7[%c0_6, %c0_7] : memref<256x128xf32, #tpu.memory_space<vmem>>, vector<256x128xf32>
    tpu.vector_store %arg7[%c0_6, %c0_7], %7 {strides = array<i32>} : memref<256x128xf32, #tpu.memory_space<vmem>>, vector<256x128xf32>,
    %c0_i32_8 = arith.constant 0 : i32
    %9 = arith.cmpi eq, %arg1, %c0_i32_8 : i32
    %10 = arith.extui %9 : i1 to i32
    %c0_i32_9 = arith.constant 0 : i32
    %11 = arith.cmpi ne, %10, %c0_i32_9 : i32
    scf.if %11 {
      %c0_10 = arith.constant 0 : index
      %c0_11 = arith.constant 0 : index
      %12 = vector.load %arg7[%c0_10, %c0_11] : memref<256x128xf32, #tpu.memory_space<vmem>>, vector<256x128xf32>
      %c0_12 = arith.constant 0 : index
      %c0_13 = arith.constant 0 : index
      %13 = vector.load %arg4[%c0_12, %c0_13] : memref<1x128xf32, #tpu.memory_space<vmem>>, vector<1x128xf32>
      %14 = vector.broadcast %13 : vector<1x128xf32> to vector<256x128xf32>
      %15 = arith.mulf %12, %14 : vector<256x128xf32>
      %c0_14 = arith.constant 0 : index
      %c0_15 = arith.constant 0 : index
      %16 = vector.load %arg5[%c0_14, %c0_15] : memref<1x128xf32, #tpu.memory_space<vmem>>, vector<1x128xf32>
      %17 = vector.broadcast %16 : vector<1x128xf32> to vector<256x128xf32>
      %18 = arith.addf %15, %17 : vector<256x128xf32>
      %c0_16 = arith.constant 0 : index
      %c0_17 = arith.constant 0 : index
      %19 = vector.load %arg6[%c0_16, %c0_17] : memref<256x128xf32, #tpu.memory_space<vmem>>, vector<256x128xf32>
      %20 = arith.addf %18, %19 : vector<256x128xf32>
      %cst_18 = arith.constant 0.000000e+00 : f32
      %21 = vector.broadcast %cst_18 : f32 to vector<256x128xf32>
      %22 = arith.maximumf %20, %21 : vector<256x128xf32>
      %c0_19 = arith.constant 0 : index
      %c0_20 = arith.constant 0 : index
      %23 = vector.load %arg7[%c0_19, %c0_20] : memref<256x128xf32, #tpu.memory_space<vmem>>, vector<256x128xf32>
      tpu.vector_store %arg7[%c0_19, %c0_20], %22 {strides = array<i32>} : memref<256x128xf32, #tpu.memory_space<vmem>>, vector<256x128xf32>,
    } else {
    }
    return
  }
  func.func @transform_0(%arg0: i32, %arg1: i32) -> (i32, i32) {
    %c0_i32 = arith.constant 0 : i32
    return %arg0, %arg1 : i32, i32
  }
  func.func @transform_1(%arg0: i32, %arg1: i32) -> (i32, i32) {
    %c0_i32 = arith.constant 0 : i32
    %c0_i32_0 = arith.constant 0 : i32
    return %arg1, %c0_i32 : i32, i32
  }
  func.func @transform_2(%arg0: i32, %arg1: i32) -> (i32, i32) {
    %c0_i32 = arith.constant 0 : i32
    %c0_i32_0 = arith.constant 0 : i32
    %c0_i32_1 = arith.constant 0 : i32
    return %c0_i32, %c0_i32_0 : i32, i32
  }
  func.func @transform_3(%arg0: i32, %arg1: i32) -> (i32, i32) {
    %c0_i32 = arith.constant 0 : i32
    %c0_i32_0 = arith.constant 0 : i32
    %c0_i32_1 = arith.constant 0 : i32
    return %c0_i32, %c0_i32_0 : i32, i32
  }
  func.func @transform_4(%arg0: i32, %arg1: i32) -> (i32, i32) {
    %c0_i32 = arith.constant 0 : i32
    %c0_i32_0 = arith.constant 0 : i32
    return %arg0, %c0_i32 : i32, i32
  }
  func.func @transform_5(%arg0: i32, %arg1: i32) -> (i32, i32) {
    %c0_i32 = arith.constant 0 : i32
    %c0_i32_0 = arith.constant 0 : i32
    return %arg0, %c0_i32 : i32, i32
  }
}

</mosaic_0001>

<bundles_post_ra>
// kernel: bottleneck_forward.4
= control target key start
LH: loop header
LB: loop body
LE: loop exit
PB: predicated region body
PF: predicated region fallthrough
CT: control target
= control target key end

     0   :  { %s877_s15 = smov 0   ;;  %s879_s16 = smov 0   ;;  %s1005_s0 = inlined_call_operand.vmem [shape: bf16[2,20,20,32], index: 0, kind: input, shape index: {}]   ;;  %s1006_s1 = inlined_call_operand.vmem [shape: bf16[3,3,32,32], index: 1, kind: input, shape index: {}]   ;;  %s1007_s2 = inlined_call_operand.vmem [shape: f32[1,32], index: 2, kind: input, shape index: {}]   ;;  %s1008_s3 = inlined_call_operand.vmem [shape: f32[1,32], index: 3, kind: input, shape index: {}]   ;;  %s1009_s4 = inlined_call_operand.vmem [shape: f32[2,16,16,32], index: 4, kind: output, shape index: {}]  }
   0x1   :  { %s881_s17 = smov 0   ;;  %s883_s18 = smov 0  }
   0x2   :  { %s885_s19 = smov 0   ;;  %s887_s20 = smov 0  }
   0x3   :  { %s889_s21 = smov 0  }
   0x4 LB: > { %s26_s22 = sadd.s32 1, %s835_s18  ;;  %s29_s23 = sadd.s32 1, %s839_s19  ;;  %s847_s21 = sphi %s889_s21, %s14_s21   ;;  %s843_s20 = sphi %s887_s20, %s1017_s20   ;;  %s839_s19 = sphi %s885_s19, %s1016_s19   ;;  %s835_s18 = sphi %s883_s18, %s1015_s18   ;;  %s831_s17 = sphi %s881_s17, %s1014_s17   ;;  %s827_s16 = sphi %s879_s16, %s1013_s16   ;;  %s823_s15 = sphi %s877_s15, %s1012_s15  }
   0x5   : > { %p27_p0 = scmp.ge.s32.totalorder %s26_s22, 3  ;;  %p652_p1 = scmp.ge.s32.totalorder %s847_s21, 1 }
   0x6   : > { %p207_p2 = scmp.lt.s32.totalorder %s847_s21, 97  ;;  %s33_s24 = sadd.s32 1, %s843_s20 }
   0x7   : > { %s1019_s22 = smov (%p27_p0, %s26_s22), 0  ;;  %s1021_s23 = smov (!%p27_p0, %s29_s23), %s839_s19 }
   0x8   : > { %p208_p3 = pnand %p652_p1, %p207_p2  ;;  %p31_p4 = scmp.ge.s32.totalorder %s1021_s23, 16 }
   0x9   : > { %s653_s25 = sshll.u32 (!%p208_p3), %s823_s15, 1  ;;  %p250_p6 = scmp.lt.s32.totalorder (!%p208_p3), %s831_s17, 1 }
   0xa   : > { %s1023_s23 = smov (%p31_p4, %s1021_s23), 0  ;;  %s1025_s24 = smov (!%p31_p4, %s33_s24), %s843_s20 }
   0xb   : > { %p35_p5 = scmp.ge.s32.totalorder %s1025_s24, 2  ;;  %211 = sbr.rel (%p208_p3) target bundleno = 264 (0x108), region = 36 }
   0xc   : > { %s249_s26 = sadd.s32 (!%p208_p3), %s827_s16, %s653_s25  ;;  %p261_p7 = scmp.lt.s32.totalorder (!%p208_p3), %s823_s15, 2 }
   0xd   : > { %s1027_s24 = smov (%p35_p5, %s1025_s24), 0  ;;  %p252_p8 = scmp.lt.s32.totalorder (!%p208_p3), %s249_s26, 19 }
   0xe   : > { %1010 = sst [smem:[#allocation2_spill]] %s1027_s24  ;;  %p268_p9 = scmp.lt.s32.totalorder (!%p208_p3), %s827_s16, 15 }
   0xf   : > { %p659_p10 = scmp.ne.s32.totalorder (!%p208_p3), %s823_s15, 0 }
  0x10   : > { %s1029_s17 = smov (!%p250_p6, %s831_s17), 1  ;;  %s1031_s26 = smov (!%p252_p8, %s249_s26), 19 }
  0x11   : > { %s721_s27 = smul.u32 60, %s1029_s17  ;;  %s657_s13 = sshll.u32 %s1029_s17, 5 }
  0x12   : > { %s262_s28 = scalar_select %p261_p7, %s823_s15, 2 }
  0x13   : > { %s720_s29 = smul.u32 3, %s1031_s26  ;;  %s1033_s16 = smov (!%p268_p9, %s827_s16), 15 }
  0x14   : > { %s722_s30 = smul.u32 48, %s262_s28  ;;  %s656_s14 = sshll.u32 %s1033_s16, 1 }
  0x15   : > { %s256_s5 = sadd.s32 %s721_s27, %s720_s29  ;;  %s272_s25 = sadd.s32 %s657_s13, %s656_s14 }
  0x16   : > { %s654_s6 = sshll.u32 %s256_s5, 2  ;;  %s931_s9 = scalar_lea.vmem %s1006_s1, %s722_s30 }
  0x17   : > { %s936_s12 = scalar_lea.vmem %s1005_s0, %s654_s6  ;;  %s658_s24 = sshll.u32 %s272_s25, 3 }
  0x18   : > { %s942_s27 = scalar_lea.vmem %s1009_s4, %s658_s24  ;;  %279 = sbr.rel (%p659_p10) target bundleno = 31 (0x1f), region = 40 }
  0x1d   : > { %vm280_vm0 = vcmask 261120   ;;  %v849_v0 = vmov 0.0  }
  0x1e   : > { %281 = vst.msk [vmem:[%s942_s27] sm:$0xff] %vm280_vm0, %v849_v0  ;;  %282 = vst.msk [vmem:[%s942_s27 + $0x8] sm:$0xff] %vm280_vm0, %v849_v0 }
  0x1f PF: > { %v782_v1 = vld [vmem:[%s931_s9 + $0x18] sm:$0xff]   ;;  %v850_v2 = vmov 0.0   ;;  %v783_v3 = vld [vmem:[%s931_s9 + $0x8] sm:$0xff]   ;;  %v784_v4 = vld [vmem:[%s931_s9 + $0x10] sm:$0xff]   ;;  %vm851_vm1 = vmmov 0   ;;  %vm304_vm2 = vcmask 1046528  }
  0x20   : > { %696 = vmatprep.subr.bf16.mxu0 %v850_v2  ;;  %704 = vmatprep.subr.bf16.mxu1 %v850_v2  ;;  %v785_v5 = vld [vmem:[%s931_s9] sm:$0xff]   ;;  %v787_v9 = vld [vmem:[%s936_s12 + $0x8] ss:$0 sps:$4 sm:$0x11]   ;;  %vm320_vm3 = vcmask 261120   ;;  %vm437_vm4 = vcmask 1045504  }
  0x21   : > { %697 = vmatpush3.bf16.msra.mxu0 %v782_v1  ;;  %700 = vmatprep.mubr.msk.bf16.mxu0 %vm851_vm1, %v850_v2  ;;  %v284_v6 = vld [vmem:[%s936_s12 + $0x4] sm:$0xf]  ;;  %v289_v7 = vld [vmem:[%s936_s12] sm:$0xe]  ;;  %v306_v13 = vrot.slane %v787_v9, 1  ;;  %v789_v14 = vld [vmem:[%s931_s9 + $0x28] sm:$0xff]  }
  0x22   : > { %705 = vmatpush3.bf16.msra.mxu1 %v783_v3  ;;  %698 = vmatprep.subr.bf16.mxu0 %v850_v2  ;;  %v664_v8 = vcombine.low %v289_v7, %v284_v6  ;;  %v283_v10 = vld [vmem:[%s936_s12] sm:$0xf]  ;;  %v792_v18 = vld [vmem:[%s936_s12 + $0x8] ss:$0 sps:$4 sm:$0x33]   ;;  %p682_p11 = scmp.ne.s32.totalorder %s823_s15, 2 }
  0x23   : > { %706 = vmatprep.subr.bf16.mxu1 %v850_v2  ;;  %708 = vmatprep.mubr.msk.bf16.mxu1 %vm851_vm1, %v850_v2  ;;  %v669_v11 = vcombine.low %v283_v10, %v284_v6  ;;  %v424_v15 = vld [vmem:[%s936_s12] sm:$0xc]  ;;  %v439_v21 = vrot.slane %v792_v18, 2 }
  0x24   : > { %v305_v12 = vrot.slane %v664_v8, 1  ;;  %v677_v17 = vcombine.low %v424_v15, %v284_v6  ;;  %v790_v19 = vld [vmem:[%s931_s9 + $0x20] sm:$0xff]  }
  0x25   : > { %699 = vmatpush3.bf16.msra.mxu0 %v784_v4  ;;  %v499_v33 = vld [vmem:[%s942_s27] sm:$0xff]  ;;  %v500_v39 = vld [vmem:[%s942_s27 + $0x8] sm:$0xff] }
  0x26   : > { %707 = vmatpush3.bf16.msra.mxu1 %v785_v5  ;;  %712 = vmatprep.subr.bf16.mxu0 %v850_v2  ;;  %v307_v16 = vsel %vm304_vm2, %v305_v12, %v306_v13  ;;  %v438_v20 = vrot.slane %v677_v17, 2 }
  0x28   : > { %701 = vmatmul.mubr.msk.bf16.vlgmr.msra.gmra.mxu0 %vm320_vm3, %v307_v16  ;;  %v440_v22 = vsel %vm437_vm4, %v438_v20, %v439_v21 }
  0x29   : > { %709 = vmatmul.mubr.msk.bf16.vlgmr.msra.gmra.mxu1 %vm320_vm3, %v669_v11  ;;  %713 = vmatpush3.bf16.msra.mxu0 %v789_v14 }
  0x2a   : > { %716 = vmatprep.mubr.msk.bf16.mxu0 %vm851_vm1, %v850_v2  ;;  %714 = vmatprep.subr.bf16.mxu0 %v850_v2 }
  0x2d   : > { %715 = vmatpush3.bf16.msra.mxu0 %v790_v19 }
  0x30   : > { %717 = vmatmul.mubr.msk.bf16.vlgmr.msra.gmra.mxu0 %vm320_vm3, %v440_v22 }
  0xe8   : > { %v358_v23 = vpop.f32.mrf.mxu0 }
  0xe9   : > { %v417_v24 = vpop.f32.mrf.mxu1 }
  0xea   : > { %v702_v25 = vpop.f32.mrf.mxu0  ;;  %v418_v31 = vadd.f32 %v417_v24, %v358_v23 }
  0xeb   : > { %v710_v26 = vpop.f32.mrf.mxu1 }
  0xec   : > { %v361_v27 = vpop.f32.mrf.mxu0 }
  0xed   : > { %v420_v28 = vpop.f32.mrf.mxu1 }
  0xee   : > { %v703_v29 = vpop.f32.mrf.mxu0  ;;  %v421_v36 = vadd.f32 %v420_v28, %v361_v27 }
  0xef   : > { %v711_v30 = vpop.f32.mrf.mxu1 }
  0xf0   : > { %v490_v32 = vpop.f32.mrf.mxu0 }
  0xf1   : > { %v497_v34 = vadd.f32 %v490_v32, %v418_v31 }
  0xf2   : > { %v718_v35 = vpop.f32.mrf.mxu0 }
  0xf3   : > { %v501_v37 = vadd.f32 %v499_v33, %v497_v34 }
  0xf4   : > { %v493_v38 = vpop.f32.mrf.mxu0 }
  0xf5   : > { %503 = vst.msk [vmem:[%s942_s27] sm:$0xff] %vm320_vm3, %v501_v37  ;;  %v498_v40 = vadd.f32 %v493_v38, %v421_v36  ;;  %508 = sbr.rel (%p682_p11) target bundleno = 264 (0x108), region = 44 }
  0xf6   : > { %v719_v41 = vpop.f32.mrf.mxu0 }
  0xf7   : > { %v502_v42 = vadd.f32 %v500_v39, %v498_v40 }
  0xf9   : > { %504 = vst.msk [vmem:[%s942_s27 + $0x8] sm:$0xff] %vm320_vm3, %v502_v42 }
  0xfa   : > { %v683_v44 = vld [vmem:[%s1007_s2] ss:$0 sm:$0xff] }
  0xfb   : > { %v684_v45 = vld [vmem:[%s1008_s3] ss:$0 sm:$0xff] }
  0xfc   : > { %v509_v43 = vld [vmem:[%s942_s27] sm:$0xff] }
  0xfd   : > { %v518_v46 = vmul.f32 %v683_v44, %v509_v43 }
  0xff   : > { %v527_v49 = vadd.f32 %v684_v45, %v518_v46 }
 0x100   : > { %v510_v47 = vld [vmem:[%s942_s27 + $0x8] sm:$0xff] }
 0x101   : > { %v519_v48 = vmul.f32 %v683_v44, %v510_v47  ;;  %v529_v51 = vmax.f32 %v527_v49, 0.0 }
 0x103   : > { %v528_v50 = vadd.f32 %v684_v45, %v519_v48  ;;  %531 = vst.msk [vmem:[%s942_s27] sm:$0xff] %vm320_vm3, %v529_v51 }
 0x105   : > { %v530_v52 = vmax.f32 %v528_v50, 0.0 }
 0x107   : > { %532 = vst.msk [vmem:[%s942_s27 + $0x8] sm:$0xff] %vm320_vm3, %v530_v52 }
 0x108 PF: > { %s14_s21 = sadd.s32 1, %s847_s21   ;;  %s1011_s30 = sld [smem:[#allocation2_spill]] }
 0x109   : > { %p11_p12 = scmp.ge.s32.totalorder %s14_s21, 98   ;;  %s1012_s15 = smov %s835_s18 }
 0x10a   : > { %s1013_s16 = smov %s839_s19  ;;  %s1014_s17 = smov %s843_s20 }
 0x10b   : > { %s1015_s18 = smov %s1019_s22  ;;  %s1016_s19 = smov %s1023_s23 }
 0x10c   :  { %13 = sbr.rel (!%p11_p12) target bundleno = 4 (0x4), region = 79 }
 0x10e   : > { %s1017_s20 = smov %s1011_s30 }

// kernel: bottleneck_forward.3
= control target key start
LH: loop header
LB: loop body
LE: loop exit
PB: predicated region body
PF: predicated region fallthrough
CT: control target
= control target key end

     0   :  { %s1219_s15 = smov 0   ;;  %s1221_s16 = smov 0   ;;  %s1626_s0 = inlined_call_operand.vmem [shape: bf16[512,128], index: 0, kind: input, shape index: {}]   ;;  %s1627_s1 = inlined_call_operand.vmem [shape: bf16[128,32], index: 1, kind: input, shape index: {}]   ;;  %s1628_s2 = inlined_call_operand.vmem [shape: f32[1,32], index: 2, kind: input, shape index: {}]   ;;  %s1629_s3 = inlined_call_operand.vmem [shape: f32[1,32], index: 3, kind: input, shape index: {}]   ;;  %s1630_s4 = inlined_call_operand.vmem [shape: f32[512,32], index: 4, kind: output, shape index: {}]  }
   0x1   :  { %s1223_s17 = smov 0  }
   0x2 LB: > { %s26_s18 = sadd.s32 1, %s1187_s16  ;;  %p999_p0 = scmp.ge.s32.totalorder %s1191_s17, 1  ;;  %s1191_s17 = sphi %s1223_s17, %s14_s17   ;;  %s1187_s16 = sphi %s1221_s16, %s1632_s16   ;;  %s1183_s15 = sphi %s1219_s15, %s1631_s15  }
   0x3   : > { %p28_p1 = scmp.ge.s32.totalorder %s26_s18, 2  ;;  %p191_p2 = scmp.lt.s32.totalorder %s1191_s17, 3 }
   0x5   : > { %s1634_s18 = smov (%p28_p1, %s26_s18), 0  ;;  %p192_p3 = pnand %p999_p0, %p191_p2 }
   0x6   : > { %s1000_s21 = sshll.u32 (!%p192_p3), %s1183_s15, 5 }
   0x7   : > { %195 = sbr.rel (%p192_p3) target bundleno = 286 (0x11e), region = 36  ;;  %p226_p4 = scmp.lt.s32.totalorder (!%p192_p3), %s1000_s21, 63 }
   0xc   : > { %v1145_v0 = vld [vmem:[%s1627_s1 + $0x38] sm:$0xff]   ;;  %v1146_v1 = vld [vmem:[%s1627_s1 + $0x30] sm:$0xff]   ;;  %s1636_s21 = smov (!%p226_p4, %s1000_s21), 63  ;;  %v1147_v2 = vld [vmem:[%s1627_s1 + $0x28] sm:$0xff]   ;;  %vm251_vm0 = vcmask 261120   ;;  %v1193_v5 = vmov 0.0  }
   0xd   : > { %1056 = vmatprep.subr.bf16.mxu0 %v1145_v0  ;;  %1104 = vmatprep.subr.bf16.mxu1 %v1145_v0  ;;  %s1001_s26 = sshll.u32 %s1636_s21, 2  ;;  %s1003_s30 = sshll.u32 %s1636_s21, 3  ;;  %v1148_v3 = vld [vmem:[%s1627_s1 + $0x20] sm:$0xff]   ;;  %v1149_v7 = vld [vmem:[%s1627_s1 + $0x18] sm:$0xff]   ;;  %v1150_v8 = vld [vmem:[%s1627_s1 + $0x10] sm:$0xff]  }
   0xe   : > { %1057 = vmatpush3.bf16.msra.mxu0 %v1145_v0  ;;  %1112 = vmatpush3.bf16.msra.mxu1 %v1145_v0  ;;  %s1249_s29 = scalar_lea.vmem %s1626_s0, %s1001_s26  ;;  %s1257_s9 = scalar_lea.vmem %s1630_s4, %s1003_s30  ;;  %v1151_v9 = vld [vmem:[%s1627_s1 + $0x8] sm:$0xff]   ;;  %v1152_v10 = vld [vmem:[%s1627_s1] sm:$0xff]  }
   0xf   : > { %1058 = vmatprep.subr.bf16.mxu0 %v1146_v1  ;;  %1105 = vmatprep.subr.bf16.mxu1 %v1146_v1  ;;  %v1153_v4 = vld [vmem:[%s1249_s29] sm:$0xff]   ;;  %254 = vst.msk [vmem:[%s1257_s9 + $0x10] sm:$0xff] %vm251_vm0, %v1193_v5  ;;  %252 = vst.msk [vmem:[%s1257_s9] sm:$0xff] %vm251_vm0, %v1193_v5  ;;  %v1155_v11 = vld [vmem:[%s1249_s29 + $0x8] sm:$0xff]  }
  0x10   : > { %253 = vst.msk [vmem:[%s1257_s9 + $0x8] sm:$0xff] %vm251_vm0, %v1193_v5  ;;  %255 = vst.msk [vmem:[%s1257_s9 + $0x18] sm:$0xff] %vm251_vm0, %v1193_v5  ;;  %v1154_v6 = vld [vmem:[%s1249_s29 + $0x40] sm:$0xff]   ;;  %1072 = vmatprep.mubr.bf16.mxu0 %v1153_v4  ;;  %v1156_v12 = vld [vmem:[%s1249_s29 + $0x48] sm:$0xff]  }
  0x11   : > { %256 = vst.msk [vmem:[%s1257_s9 + $0x20] sm:$0xff] %vm251_vm0, %v1193_v5  ;;  %257 = vst.msk [vmem:[%s1257_s9 + $0x28] sm:$0xff] %vm251_vm0, %v1193_v5  ;;  %1088 = vmatprep.mubr.bf16.mxu1 %v1154_v6  ;;  %v1157_v13 = vld [vmem:[%s1249_s29 + $0x10] sm:$0xff]   ;;  %v1159_v15 = vld [vmem:[%s1249_s29 + $0x18] sm:$0xff]  }
  0x12   : > { %1059 = vmatpush3.bf16.msra.mxu0 %v1146_v1  ;;  %1113 = vmatpush3.bf16.msra.mxu1 %v1146_v1  ;;  %258 = vst.msk [vmem:[%s1257_s9 + $0x30] sm:$0xff] %vm251_vm0, %v1193_v5  ;;  %259 = vst.msk [vmem:[%s1257_s9 + $0x38] sm:$0xff] %vm251_vm0, %v1193_v5  ;;  %v1158_v14 = vld [vmem:[%s1249_s29 + $0x50] sm:$0xff]   ;;  %v1160_v16 = vld [vmem:[%s1249_s29 + $0x58] sm:$0xff]  }
  0x13   : > { %1060 = vmatprep.subr.bf16.mxu0 %v1147_v2  ;;  %1106 = vmatprep.subr.bf16.mxu1 %v1147_v2  ;;  %260 = vst.msk [vmem:[%s1257_s9 + $0x40] sm:$0xff] %vm251_vm0, %v1193_v5  ;;  %261 = vst.msk [vmem:[%s1257_s9 + $0x48] sm:$0xff] %vm251_vm0, %v1193_v5  ;;  %v1161_v17 = vld [vmem:[%s1249_s29 + $0x20] sm:$0xff]   ;;  %v1163_v19 = vld [vmem:[%s1249_s29 + $0x28] sm:$0xff]  }
  0x14   : > { %262 = vst.msk [vmem:[%s1257_s9 + $0x50] sm:$0xff] %vm251_vm0, %v1193_v5  ;;  %263 = vst.msk [vmem:[%s1257_s9 + $0x58] sm:$0xff] %vm251_vm0, %v1193_v5  ;;  %v1162_v18 = vld [vmem:[%s1249_s29 + $0x60] sm:$0xff]   ;;  %v1164_v20 = vld [vmem:[%s1249_s29 + $0x68] sm:$0xff]  }
  0x15   : > { %264 = vst.msk [vmem:[%s1257_s9 + $0x60] sm:$0xff] %vm251_vm0, %v1193_v5  ;;  %265 = vst.msk [vmem:[%s1257_s9 + $0x68] sm:$0xff] %vm251_vm0, %v1193_v5  ;;  %v1165_v21 = vld [vmem:[%s1249_s29 + $0x30] sm:$0xff]   ;;  %v1167_v23 = vld [vmem:[%s1249_s29 + $0x38] sm:$0xff]  }
  0x16   : > { %266 = vst.msk [vmem:[%s1257_s9 + $0x70] sm:$0xff] %vm251_vm0, %v1193_v5  ;;  %267 = vst.msk [vmem:[%s1257_s9 + $0x78] sm:$0xff] %vm251_vm0, %v1193_v5  ;;  %1061 = vmatpush3.bf16.msra.mxu0 %v1147_v2  ;;  %1114 = vmatpush3.bf16.msra.mxu1 %v1147_v2  ;;  %v1166_v22 = vld [vmem:[%s1249_s29 + $0x70] sm:$0xff]   ;;  %v1168_v24 = vld [vmem:[%s1249_s29 + $0x78] sm:$0xff]  }
  0x17   : > { %268 = vst.msk [vmem:[%s1257_s9 + $0x80] sm:$0xff] %vm251_vm0, %v1193_v5  ;;  %269 = vst.msk [vmem:[%s1257_s9 + $0x88] sm:$0xff] %vm251_vm0, %v1193_v5  ;;  %1062 = vmatprep.subr.bf16.mxu0 %v1148_v3  ;;  %1107 = vmatprep.subr.bf16.mxu1 %v1148_v3  ;;  %v286_v25 = vld [vmem:[%s1257_s9 + $0x10] sm:$0xff]  ;;  %v284_v29 = vld [vmem:[%s1257_s9] sm:$0xff] }
  0x18   : > { %270 = vst.msk [vmem:[%s1257_s9 + $0x90] sm:$0xff] %vm251_vm0, %v1193_v5  ;;  %271 = vst.msk [vmem:[%s1257_s9 + $0x98] sm:$0xff] %vm251_vm0, %v1193_v5  ;;  %v287_v35 = vld [vmem:[%s1257_s9 + $0x18] sm:$0xff]  ;;  %v285_v41 = vld [vmem:[%s1257_s9 + $0x8] sm:$0xff] }
  0x19   : > { %272 = vst.msk [vmem:[%s1257_s9 + $0xa0] sm:$0xff] %vm251_vm0, %v1193_v5  ;;  %273 = vst.msk [vmem:[%s1257_s9 + $0xa8] sm:$0xff] %vm251_vm0, %v1193_v5  ;;  %v290_v47 = vld [vmem:[%s1257_s9 + $0x30] sm:$0xff]  ;;  %v1376_v51 = vld [vmem:[%s1628_s2] ss:$0 sm:$0xff] }
  0x1a   : > { %274 = vst.msk [vmem:[%s1257_s9 + $0xb0] sm:$0xff] %vm251_vm0, %v1193_v5  ;;  %275 = vst.msk [vmem:[%s1257_s9 + $0xb8] sm:$0xff] %vm251_vm0, %v1193_v5  ;;  %1063 = vmatpush3.bf16.msra.mxu0 %v1148_v3  ;;  %1115 = vmatpush3.bf16.msra.mxu1 %v1148_v3  ;;  %v288_v54 = vld [vmem:[%s1257_s9 + $0x20] sm:$0xff]  ;;  %v291_v3 = vld [vmem:[%s1257_s9 + $0x38] sm:$0xff] }
  0x1b   : > { %276 = vst.msk [vmem:[%s1257_s9 + $0xc0] sm:$0xff] %vm251_vm0, %v1193_v5  ;;  %277 = vst.msk [vmem:[%s1257_s9 + $0xc8] sm:$0xff] %vm251_vm0, %v1193_v5  ;;  %1064 = vmatprep.subr.bf16.mxu0 %v1149_v7  ;;  %1108 = vmatprep.subr.bf16.mxu1 %v1149_v7  ;;  %v1388_v59 = vld [vmem:[%s1629_s3] ss:$0 sm:$0xff] }
  0x1c   : > { %278 = vst.msk [vmem:[%s1257_s9 + $0xd0] sm:$0xff] %vm251_vm0, %v1193_v5  ;;  %279 = vst.msk [vmem:[%s1257_s9 + $0xd8] sm:$0xff] %vm251_vm0, %v1193_v5 }
  0x1d   : > { %280 = vst.msk [vmem:[%s1257_s9 + $0xe0] sm:$0xff] %vm251_vm0, %v1193_v5  ;;  %281 = vst.msk [vmem:[%s1257_s9 + $0xe8] sm:$0xff] %vm251_vm0, %v1193_v5 }
  0x1e   : > { %282 = vst.msk [vmem:[%s1257_s9 + $0xf0] sm:$0xff] %vm251_vm0, %v1193_v5  ;;  %283 = vst.msk [vmem:[%s1257_s9 + $0xf8] sm:$0xff] %vm251_vm0, %v1193_v5  ;;  %1065 = vmatpush3.bf16.msra.mxu0 %v1149_v7  ;;  %1116 = vmatpush3.bf16.msra.mxu1 %v1149_v7  ;;  %v300_v30 = vld [vmem:[%s1257_s9 + $0x80] sm:$0xff]  ;;  %v301_v42 = vld [vmem:[%s1257_s9 + $0x88] sm:$0xff] }
  0x1f   : > { %1066 = vmatprep.subr.bf16.mxu0 %v1150_v8  ;;  %1109 = vmatprep.subr.bf16.mxu1 %v1150_v8  ;;  %v302_v26 = vld [vmem:[%s1257_s9 + $0x90] sm:$0xff]  ;;  %v303_v36 = vld [vmem:[%s1257_s9 + $0x98] sm:$0xff] }
  0x20   : > { %v304_v55 = vld [vmem:[%s1257_s9 + $0xa0] sm:$0xff] }
  0x21   : > { %v306_v48 = vld [vmem:[%s1257_s9 + $0xb0] sm:$0xff]  ;;  %v307_v4 = vld [vmem:[%s1257_s9 + $0xb8] sm:$0xff] }
  0x22   : > { %1067 = vmatpush3.bf16.msra.mxu0 %v1150_v8  ;;  %1117 = vmatpush3.bf16.msra.mxu1 %v1150_v8 }
  0x23   : > { %1068 = vmatprep.subr.bf16.mxu0 %v1151_v9  ;;  %1110 = vmatprep.subr.bf16.mxu1 %v1151_v9 }
  0x26   : > { %1069 = vmatpush3.bf16.msra.mxu0 %v1151_v9  ;;  %1118 = vmatpush3.bf16.msra.mxu1 %v1151_v9 }
  0x27   : > { %1070 = vmatprep.subr.bf16.mxu0 %v1152_v10  ;;  %1111 = vmatprep.subr.bf16.mxu1 %v1152_v10 }
  0x2a   : > { %1071 = vmatpush3.bf16.msra.mxu0 %v1152_v10  ;;  %1119 = vmatpush3.bf16.msra.mxu1 %v1152_v10 }
  0x2d   : > { %1073 = vmatmul.mubr.bf16.vlgmr.msra.gmra.mxu0 %v1155_v11  ;;  %1089 = vmatmul.mubr.bf16.vlgmr.msra.gmra.mxu1 %v1156_v12 }
  0x2e   : > { %1076 = vmatprep.mubr.bf16.mxu0 %v1157_v13  ;;  %1092 = vmatprep.mubr.bf16.mxu1 %v1158_v14  ;;  %v289_v13 = vld [vmem:[%s1257_s9 + $0x28] sm:$0xff] }
  0x2f   : > { %v305_v14 = vld [vmem:[%s1257_s9 + $0xa8] sm:$0xff] }
  0x35   : > { %1077 = vmatmul.mubr.bf16.gmra.mxu0 %v1159_v15  ;;  %1093 = vmatmul.mubr.bf16.gmra.mxu1 %v1160_v16 }
  0x36   : > { %1080 = vmatprep.mubr.bf16.mxu0 %v1161_v17  ;;  %1096 = vmatprep.mubr.bf16.mxu1 %v1162_v18 }
  0x3d   : > { %1081 = vmatmul.mubr.bf16.gmra.mxu0 %v1163_v19  ;;  %1097 = vmatmul.mubr.bf16.gmra.mxu1 %v1164_v20 }
  0x3e   : > { %1084 = vmatprep.mubr.bf16.mxu0 %v1165_v21  ;;  %1100 = vmatprep.mubr.bf16.mxu1 %v1166_v22 }
  0x45   : > { %1085 = vmatmul.mubr.bf16.gmra.mxu0 %v1167_v23  ;;  %1101 = vmatmul.mubr.bf16.gmra.mxu1 %v1168_v24 }
  0xed   : > { %v1074_v27 = vpop.f32.mrf.mxu0  ;;  %v1090_v28 = vpop.f32.mrf.mxu1 }
  0xee   : > { %v671_v31 = vadd.f32 %v1074_v27, %v286_v25  ;;  %v687_v32 = vadd.f32 %v1090_v28, %v302_v26  ;;  %v294_v25 = vld [vmem:[%s1257_s9 + $0x50] sm:$0xff] }
  0xef   : > { %v542_v33 = vpop.f32.mrf.mxu0  ;;  %v606_v34 = vpop.f32.mrf.mxu1  ;;  %v310_v26 = vld [vmem:[%s1257_s9 + $0xd0] sm:$0xff] }
  0xf0   : > { %704 = vst.msk [vmem:[%s1257_s9 + $0x10] sm:$0xff] %vm251_vm0, %v671_v31  ;;  %720 = vst.msk [vmem:[%s1257_s9 + $0x90] sm:$0xff] %vm251_vm0, %v687_v32  ;;  %v669_v37 = vadd.f32 %v542_v33, %v284_v29  ;;  %v685_v38 = vadd.f32 %v606_v34, %v300_v30 }
  0xf1   : > { %v1075_v39 = vpop.f32.mrf.mxu0  ;;  %v1091_v40 = vpop.f32.mrf.mxu1 }
  0xf2   : > { %702 = vst.msk [vmem:[%s1257_s9] sm:$0xff] %vm251_vm0, %v669_v37  ;;  %718 = vst.msk [vmem:[%s1257_s9 + $0x80] sm:$0xff] %vm251_vm0, %v685_v38  ;;  %v672_v43 = vadd.f32 %v1075_v39, %v287_v35  ;;  %v688_v44 = vadd.f32 %v1091_v40, %v303_v36  ;;  %v292_v39 = vld [vmem:[%s1257_s9 + $0x40] sm:$0xff] }
  0xf3   : > { %v545_v45 = vpop.f32.mrf.mxu0  ;;  %v609_v46 = vpop.f32.mrf.mxu1  ;;  %v308_v40 = vld [vmem:[%s1257_s9 + $0xc0] sm:$0xff] }
  0xf4   : > { %705 = vst.msk [vmem:[%s1257_s9 + $0x18] sm:$0xff] %vm251_vm0, %v672_v43  ;;  %721 = vst.msk [vmem:[%s1257_s9 + $0x98] sm:$0xff] %vm251_vm0, %v688_v44  ;;  %v670_v49 = vadd.f32 %v545_v45, %v285_v41  ;;  %v686_v50 = vadd.f32 %v609_v46, %v301_v42 }
  0xf5   : > { %v1078_v52 = vpop.f32.mrf.mxu0  ;;  %v1094_v53 = vpop.f32.mrf.mxu1 }
  0xf6   : > { %703 = vst.msk [vmem:[%s1257_s9 + $0x8] sm:$0xff] %vm251_vm0, %v670_v49  ;;  %719 = vst.msk [vmem:[%s1257_s9 + $0x88] sm:$0xff] %vm251_vm0, %v686_v50  ;;  %v675_v56 = vadd.f32 %v1078_v52, %v290_v47  ;;  %v691_v57 = vadd.f32 %v1094_v53, %v306_v48 }
  0xf7   : > { %v739_v58 = vld [vmem:[%s1257_s9 + $0x10] sm:$0xff]  ;;  %v558_v61 = vpop.f32.mrf.mxu0  ;;  %v622_v62 = vpop.f32.mrf.mxu1 }
  0xf8   : > { %v755_v60 = vld [vmem:[%s1257_s9 + $0x90] sm:$0xff]  ;;  %v778_v63 = vmul.f32 %v1376_v51, %v739_v58  ;;  %708 = vst.msk [vmem:[%s1257_s9 + $0x30] sm:$0xff] %vm251_vm0, %v675_v56  ;;  %724 = vst.msk [vmem:[%s1257_s9 + $0xb0] sm:$0xff] %vm251_vm0, %v691_v57  ;;  %v673_v1 = vadd.f32 %v558_v61, %v288_v54  ;;  %v689_v2 = vadd.f32 %v622_v62, %v304_v55  ;;  %v295_v54 = vld [vmem:[%s1257_s9 + $0x58] sm:$0xff] }
  0xf9   : > { %v794_v0 = vmul.f32 %v1376_v51, %v755_v60  ;;  %v737_v5 = vld [vmem:[%s1257_s9] sm:$0xff]  ;;  %v1079_v7 = vpop.f32.mrf.mxu0  ;;  %v1095_v8 = vpop.f32.mrf.mxu1  ;;  %v311_v55 = vld [vmem:[%s1257_s9 + $0xd8] sm:$0xff]  ;;  %v293_v56 = vld [vmem:[%s1257_s9 + $0x48] sm:$0xff] }
  0xfa   : > { %v753_v6 = vld [vmem:[%s1257_s9 + $0x80] sm:$0xff]  ;;  %v817_v9 = vadd.f32 %v1388_v59, %v778_v63  ;;  %v776_v11 = vmul.f32 %v1376_v51, %v737_v5  ;;  %706 = vst.msk [vmem:[%s1257_s9 + $0x20] sm:$0xff] %vm251_vm0, %v673_v1  ;;  %722 = vst.msk [vmem:[%s1257_s9 + $0xa0] sm:$0xff] %vm251_vm0, %v689_v2  ;;  %v676_v17 = vadd.f32 %v1079_v7, %v291_v3  ;;  %v309_v2 = vld [vmem:[%s1257_s9 + $0xc8] sm:$0xff] }
  0xfb   : > { %v833_v10 = vadd.f32 %v1388_v59, %v794_v0  ;;  %v792_v12 = vmul.f32 %v1376_v51, %v753_v6  ;;  %v740_v15 = vld [vmem:[%s1257_s9 + $0x18] sm:$0xff]  ;;  %v692_v18 = vadd.f32 %v1095_v8, %v307_v4  ;;  %v561_v19 = vpop.f32.mrf.mxu0  ;;  %v625_v20 = vpop.f32.mrf.mxu1 }
  0xfc   : > { %v756_v16 = vld [vmem:[%s1257_s9 + $0x98] sm:$0xff]  ;;  %v849_v21 = vmax.f32 %v817_v9, 0.0  ;;  %v815_v23 = vadd.f32 %v1388_v59, %v776_v11  ;;  %v779_v27 = vmul.f32 %v1376_v51, %v740_v15  ;;  %709 = vst.msk [vmem:[%s1257_s9 + $0x38] sm:$0xff] %vm251_vm0, %v676_v17  ;;  %v674_v31 = vadd.f32 %v561_v19, %v289_v13  ;;  %v298_v13 = vld [vmem:[%s1257_s9 + $0x70] sm:$0xff] }
  0xfd   : > { %v865_v22 = vmax.f32 %v833_v10, 0.0  ;;  %v831_v24 = vadd.f32 %v1388_v59, %v792_v12  ;;  %v795_v28 = vmul.f32 %v1376_v51, %v756_v16  ;;  %v738_v29 = vld [vmem:[%s1257_s9 + $0x8] sm:$0xff]  ;;  %725 = vst.msk [vmem:[%s1257_s9 + $0xb8] sm:$0xff] %vm251_vm0, %v692_v18  ;;  %v690_v32 = vadd.f32 %v625_v20, %v305_v14  ;;  %v1082_v33 = vpop.f32.mrf.mxu0  ;;  %v1098_v34 = vpop.f32.mrf.mxu1  ;;  %v314_v14 = vld [vmem:[%s1257_s9 + $0xf0] sm:$0xff] }
  0xfe   : > { %v754_v30 = vld [vmem:[%s1257_s9 + $0x88] sm:$0xff]  ;;  %881 = vst.msk [vmem:[%s1257_s9 + $0x10] sm:$0xff] %vm251_vm0, %v849_v21  ;;  %v847_v35 = vmax.f32 %v815_v23, 0.0  ;;  %v777_v37 = vmul.f32 %v1376_v51, %v738_v29  ;;  %v818_v41 = vadd.f32 %v1388_v59, %v779_v27  ;;  %707 = vst.msk [vmem:[%s1257_s9 + $0x28] sm:$0xff] %vm251_vm0, %v674_v31  ;;  %v679_v45 = vadd.f32 %v1082_v33, %v294_v25  ;;  %v296_v27 = vld [vmem:[%s1257_s9 + $0x60] sm:$0xff] }
  0xff   : > { %897 = vst.msk [vmem:[%s1257_s9 + $0x90] sm:$0xff] %vm251_vm0, %v865_v22  ;;  %v863_v36 = vmax.f32 %v831_v24, 0.0  ;;  %v793_v38 = vmul.f32 %v1376_v51, %v754_v30  ;;  %v834_v42 = vadd.f32 %v1388_v59, %v795_v28  ;;  %v743_v43 = vld [vmem:[%s1257_s9 + $0x30] sm:$0xff]  ;;  %723 = vst.msk [vmem:[%s1257_s9 + $0xa8] sm:$0xff] %vm251_vm0, %v690_v32  ;;  %v695_v46 = vadd.f32 %v1098_v34, %v310_v26  ;;  %v574_v47 = vpop.f32.mrf.mxu0  ;;  %v638_v48 = vpop.f32.mrf.mxu1  ;;  %v312_v28 = vld [vmem:[%s1257_s9 + $0xe0] sm:$0xff] }
 0x100   : > { %v759_v44 = vld [vmem:[%s1257_s9 + $0xb0] sm:$0xff]  ;;  %879 = vst.msk [vmem:[%s1257_s9] sm:$0xff] %vm251_vm0, %v847_v35  ;;  %v816_v49 = vadd.f32 %v1388_v59, %v777_v37  ;;  %v782_v52 = vmul.f32 %v1376_v51, %v743_v43  ;;  %v850_v57 = vmax.f32 %v818_v41, 0.0  ;;  %712 = vst.msk [vmem:[%s1257_s9 + $0x50] sm:$0xff] %vm251_vm0, %v679_v45  ;;  %v677_v62 = vadd.f32 %v574_v47, %v292_v39  ;;  %v299_v39 = vld [vmem:[%s1257_s9 + $0x78] sm:$0xff] }
 0x101   : > { %895 = vst.msk [vmem:[%s1257_s9 + $0x80] sm:$0xff] %vm251_vm0, %v863_v36  ;;  %v832_v50 = vadd.f32 %v1388_v59, %v793_v38  ;;  %v798_v53 = vmul.f32 %v1376_v51, %v759_v44  ;;  %v866_v58 = vmax.f32 %v834_v42, 0.0  ;;  %v741_v60 = vld [vmem:[%s1257_s9 + $0x20] sm:$0xff]  ;;  %728 = vst.msk [vmem:[%s1257_s9 + $0xd0] sm:$0xff] %vm251_vm0, %v695_v46  ;;  %v693_v63 = vadd.f32 %v638_v48, %v308_v40  ;;  %v1083_v0 = vpop.f32.mrf.mxu0  ;;  %v1099_v1 = vpop.f32.mrf.mxu1  ;;  %v315_v40 = vld [vmem:[%s1257_s9 + $0xf8] sm:$0xff] }
 0x102   : > { %v757_v61 = vld [vmem:[%s1257_s9 + $0xa0] sm:$0xff]  ;;  %v848_v3 = vmax.f32 %v816_v49, 0.0  ;;  %v821_v5 = vadd.f32 %v1388_v59, %v782_v52  ;;  %882 = vst.msk [vmem:[%s1257_s9 + $0x18] sm:$0xff] %vm251_vm0, %v850_v57  ;;  %v780_v7 = vmul.f32 %v1376_v51, %v741_v60  ;;  %710 = vst.msk [vmem:[%s1257_s9 + $0x40] sm:$0xff] %vm251_vm0, %v677_v62  ;;  %v680_v9 = vadd.f32 %v1083_v0, %v295_v54  ;;  %v297_v54 = vld [vmem:[%s1257_s9 + $0x68] sm:$0xff] }
 0x103   : > { %v864_v4 = vmax.f32 %v832_v50, 0.0  ;;  %v837_v6 = vadd.f32 %v1388_v59, %v798_v53  ;;  %898 = vst.msk [vmem:[%s1257_s9 + $0x98] sm:$0xff] %vm251_vm0, %v866_v58  ;;  %v796_v8 = vmul.f32 %v1376_v51, %v757_v61  ;;  %726 = vst.msk [vmem:[%s1257_s9 + $0xc0] sm:$0xff] %vm251_vm0, %v693_v63  ;;  %v696_v10 = vadd.f32 %v1099_v1, %v311_v55  ;;  %v577_v11 = vpop.f32.mrf.mxu0  ;;  %v641_v12 = vpop.f32.mrf.mxu1  ;;  %v744_v17 = vld [vmem:[%s1257_s9 + $0x38] sm:$0xff]  ;;  %v313_v55 = vld [vmem:[%s1257_s9 + $0xe8] sm:$0xff] }
 0x104   : > { %880 = vst.msk [vmem:[%s1257_s9 + $0x8] sm:$0xff] %vm251_vm0, %v848_v3  ;;  %v853_v15 = vmax.f32 %v821_v5, 0.0  ;;  %v760_v18 = vld [vmem:[%s1257_s9 + $0xb8] sm:$0xff]  ;;  %v678_v19 = vadd.f32 %v577_v11, %v293_v56  ;;  %v694_v20 = vadd.f32 %v641_v12, %v309_v2  ;;  %v819_v21 = vadd.f32 %v1388_v59, %v780_v7  ;;  %713 = vst.msk [vmem:[%s1257_s9 + $0x58] sm:$0xff] %vm251_vm0, %v680_v9 }
 0x105   : > { %896 = vst.msk [vmem:[%s1257_s9 + $0x88] sm:$0xff] %vm251_vm0, %v864_v4  ;;  %v869_v16 = vmax.f32 %v837_v6, 0.0  ;;  %v835_v22 = vadd.f32 %v1388_v59, %v796_v8  ;;  %v783_v23 = vmul.f32 %v1376_v51, %v744_v17  ;;  %v799_v24 = vmul.f32 %v1376_v51, %v760_v18  ;;  %729 = vst.msk [vmem:[%s1257_s9 + $0xd8] sm:$0xff] %vm251_vm0, %v696_v10  ;;  %v1086_v25 = vpop.f32.mrf.mxu0  ;;  %v1102_v26 = vpop.f32.mrf.mxu1  ;;  %v742_v29 = vld [vmem:[%s1257_s9 + $0x28] sm:$0xff] }
 0x106   : > { %885 = vst.msk [vmem:[%s1257_s9 + $0x30] sm:$0xff] %vm251_vm0, %v853_v15  ;;  %v758_v30 = vld [vmem:[%s1257_s9 + $0xa8] sm:$0xff]  ;;  %711 = vst.msk [vmem:[%s1257_s9 + $0x48] sm:$0xff] %vm251_vm0, %v678_v19  ;;  %v683_v31 = vadd.f32 %v1086_v25, %v298_v13  ;;  %v699_v32 = vadd.f32 %v1102_v26, %v314_v14  ;;  %v851_v33 = vmax.f32 %v819_v21, 0.0  ;;  %v781_v41 = vmul.f32 %v1376_v51, %v742_v29 }
 0x107   : > { %901 = vst.msk [vmem:[%s1257_s9 + $0xb0] sm:$0xff] %vm251_vm0, %v869_v16  ;;  %727 = vst.msk [vmem:[%s1257_s9 + $0xc8] sm:$0xff] %vm251_vm0, %v694_v20  ;;  %v867_v34 = vmax.f32 %v835_v22, 0.0  ;;  %v822_v35 = vadd.f32 %v1388_v59, %v783_v23  ;;  %v838_v36 = vadd.f32 %v1388_v59, %v799_v24  ;;  %v590_v37 = vpop.f32.mrf.mxu0  ;;  %v654_v38 = vpop.f32.mrf.mxu1  ;;  %v797_v42 = vmul.f32 %v1376_v51, %v758_v30  ;;  %v747_v43 = vld [vmem:[%s1257_s9 + $0x50] sm:$0xff] }
 0x108   : > { %v763_v44 = vld [vmem:[%s1257_s9 + $0xd0] sm:$0xff]  ;;  %716 = vst.msk [vmem:[%s1257_s9 + $0x70] sm:$0xff] %vm251_vm0, %v683_v31  ;;  %732 = vst.msk [vmem:[%s1257_s9 + $0xf0] sm:$0xff] %vm251_vm0, %v699_v32  ;;  %v681_v45 = vadd.f32 %v590_v37, %v296_v27  ;;  %v697_v46 = vadd.f32 %v654_v38, %v312_v28  ;;  %v786_v49 = vmul.f32 %v1376_v51, %v747_v43 }
 0x109   : > { %883 = vst.msk [vmem:[%s1257_s9 + $0x20] sm:$0xff] %vm251_vm0, %v851_v33  ;;  %899 = vst.msk [vmem:[%s1257_s9 + $0xa0] sm:$0xff] %vm251_vm0, %v867_v34  ;;  %v854_v47 = vmax.f32 %v822_v35, 0.0  ;;  %v870_v48 = vmax.f32 %v838_v36, 0.0  ;;  %v802_v50 = vmul.f32 %v1376_v51, %v763_v44  ;;  %v1087_v52 = vpop.f32.mrf.mxu0  ;;  %v1103_v53 = vpop.f32.mrf.mxu1  ;;  %v820_v56 = vadd.f32 %v1388_v59, %v781_v41  ;;  %v745_v58 = vld [vmem:[%s1257_s9 + $0x40] sm:$0xff] }
 0x10a   : > { %v836_v57 = vadd.f32 %v1388_v59, %v797_v42  ;;  %v761_v60 = vld [vmem:[%s1257_s9 + $0xc0] sm:$0xff]  ;;  %714 = vst.msk [vmem:[%s1257_s9 + $0x60] sm:$0xff] %vm251_vm0, %v681_v45  ;;  %730 = vst.msk [vmem:[%s1257_s9 + $0xe0] sm:$0xff] %vm251_vm0, %v697_v46  ;;  %v684_v61 = vadd.f32 %v1087_v52, %v299_v39  ;;  %v700_v62 = vadd.f32 %v1103_v53, %v315_v40 }
 0x10b   : > { %886 = vst.msk [vmem:[%s1257_s9 + $0x38] sm:$0xff] %vm251_vm0, %v854_v47  ;;  %902 = vst.msk [vmem:[%s1257_s9 + $0xb8] sm:$0xff] %vm251_vm0, %v870_v48  ;;  %v825_v63 = vadd.f32 %v1388_v59, %v786_v49  ;;  %v841_v0 = vadd.f32 %v1388_v59, %v802_v50  ;;  %v784_v1 = vmul.f32 %v1376_v51, %v745_v58  ;;  %v593_v3 = vpop.f32.mrf.mxu0  ;;  %v657_v4 = vpop.f32.mrf.mxu1  ;;  %v852_v5 = vmax.f32 %v820_v56, 0.0  ;;  %v748_v7 = vld [vmem:[%s1257_s9 + $0x58] sm:$0xff] }
 0x10c   : > { %v800_v2 = vmul.f32 %v1376_v51, %v761_v60  ;;  %v868_v6 = vmax.f32 %v836_v57, 0.0  ;;  %v764_v8 = vld [vmem:[%s1257_s9 + $0xd8] sm:$0xff]  ;;  %717 = vst.msk [vmem:[%s1257_s9 + $0x78] sm:$0xff] %vm251_vm0, %v684_v61  ;;  %733 = vst.msk [vmem:[%s1257_s9 + $0xf8] sm:$0xff] %vm251_vm0, %v700_v62  ;;  %v682_v9 = vadd.f32 %v593_v3, %v297_v54  ;;  %v698_v10 = vadd.f32 %v657_v4, %v313_v55 }
 0x10d   : > { %v857_v11 = vmax.f32 %v825_v63, 0.0  ;;  %v873_v12 = vmax.f32 %v841_v0, 0.0  ;;  %v823_v13 = vadd.f32 %v1388_v59, %v784_v1  ;;  %v746_v15 = vld [vmem:[%s1257_s9 + $0x48] sm:$0xff]  ;;  %884 = vst.msk [vmem:[%s1257_s9 + $0x28] sm:$0xff] %vm251_vm0, %v852_v5  ;;  %v787_v17 = vmul.f32 %v1376_v51, %v748_v7 }
 0x10e   : > { %v839_v14 = vadd.f32 %v1388_v59, %v800_v2  ;;  %v762_v16 = vld [vmem:[%s1257_s9 + $0xc8] sm:$0xff]  ;;  %900 = vst.msk [vmem:[%s1257_s9 + $0xa8] sm:$0xff] %vm251_vm0, %v868_v6  ;;  %v803_v18 = vmul.f32 %v1376_v51, %v764_v8  ;;  %v785_v19 = vmul.f32 %v1376_v51, %v746_v15  ;;  %715 = vst.msk [vmem:[%s1257_s9 + $0x68] sm:$0xff] %vm251_vm0, %v682_v9 }
 0x10f   : > { %v801_v20 = vmul.f32 %v1376_v51, %v762_v16  ;;  %731 = vst.msk [vmem:[%s1257_s9 + $0xe8] sm:$0xff] %vm251_vm0, %v698_v10  ;;  %889 = vst.msk [vmem:[%s1257_s9 + $0x50] sm:$0xff] %vm251_vm0, %v857_v11  ;;  %v855_v21 = vmax.f32 %v823_v13, 0.0  ;;  %v751_v23 = vld [vmem:[%s1257_s9 + $0x70] sm:$0xff]  ;;  %v826_v25 = vadd.f32 %v1388_v59, %v787_v17 }
 0x110   : > { %905 = vst.msk [vmem:[%s1257_s9 + $0xd0] sm:$0xff] %vm251_vm0, %v873_v12  ;;  %v871_v22 = vmax.f32 %v839_v14, 0.0  ;;  %v767_v24 = vld [vmem:[%s1257_s9 + $0xf0] sm:$0xff]  ;;  %v842_v26 = vadd.f32 %v1388_v59, %v803_v18  ;;  %v824_v27 = vadd.f32 %v1388_v59, %v785_v19  ;;  %v790_v29 = vmul.f32 %v1376_v51, %v751_v23 }
 0x111   : > { %v840_v28 = vadd.f32 %v1388_v59, %v801_v20  ;;  %887 = vst.msk [vmem:[%s1257_s9 + $0x40] sm:$0xff] %vm251_vm0, %v855_v21  ;;  %v806_v30 = vmul.f32 %v1376_v51, %v767_v24  ;;  %v749_v31 = vld [vmem:[%s1257_s9 + $0x60] sm:$0xff]  ;;  %v858_v33 = vmax.f32 %v826_v25, 0.0 }
 0x112   : > { %903 = vst.msk [vmem:[%s1257_s9 + $0xc0] sm:$0xff] %vm251_vm0, %v871_v22  ;;  %v765_v32 = vld [vmem:[%s1257_s9 + $0xe0] sm:$0xff]  ;;  %v874_v34 = vmax.f32 %v842_v26, 0.0  ;;  %v856_v35 = vmax.f32 %v824_v27, 0.0  ;;  %v829_v37 = vadd.f32 %v1388_v59, %v790_v29  ;;  %v788_v39 = vmul.f32 %v1376_v51, %v749_v31 }
 0x113   : > { %v872_v36 = vmax.f32 %v840_v28, 0.0  ;;  %v845_v38 = vadd.f32 %v1388_v59, %v806_v30  ;;  %v804_v40 = vmul.f32 %v1376_v51, %v765_v32  ;;  %v752_v41 = vld [vmem:[%s1257_s9 + $0x78] sm:$0xff]  ;;  %890 = vst.msk [vmem:[%s1257_s9 + $0x58] sm:$0xff] %vm251_vm0, %v858_v33 }
 0x114   : > { %v768_v42 = vld [vmem:[%s1257_s9 + $0xf8] sm:$0xff]  ;;  %906 = vst.msk [vmem:[%s1257_s9 + $0xd8] sm:$0xff] %vm251_vm0, %v874_v34  ;;  %888 = vst.msk [vmem:[%s1257_s9 + $0x48] sm:$0xff] %vm251_vm0, %v856_v35  ;;  %v791_v43 = vmul.f32 %v1376_v51, %v752_v41  ;;  %v861_v45 = vmax.f32 %v829_v37, 0.0  ;;  %v827_v47 = vadd.f32 %v1388_v59, %v788_v39 }
 0x115   : > { %904 = vst.msk [vmem:[%s1257_s9 + $0xc8] sm:$0xff] %vm251_vm0, %v872_v36  ;;  %v807_v44 = vmul.f32 %v1376_v51, %v768_v42  ;;  %v877_v46 = vmax.f32 %v845_v38, 0.0  ;;  %v843_v48 = vadd.f32 %v1388_v59, %v804_v40  ;;  %v750_v49 = vld [vmem:[%s1257_s9 + $0x68] sm:$0xff] }
 0x116   : > { %v766_v50 = vld [vmem:[%s1257_s9 + $0xe8] sm:$0xff]  ;;  %v830_v52 = vadd.f32 %v1388_v59, %v791_v43  ;;  %v789_v54 = vmul.f32 %v1376_v51, %v750_v49  ;;  %893 = vst.msk [vmem:[%s1257_s9 + $0x70] sm:$0xff] %vm251_vm0, %v861_v45  ;;  %v859_v56 = vmax.f32 %v827_v47, 0.0 }
 0x117   : > { %v846_v53 = vadd.f32 %v1388_v59, %v807_v44  ;;  %v805_v55 = vmul.f32 %v1376_v51, %v766_v50  ;;  %909 = vst.msk [vmem:[%s1257_s9 + $0xf0] sm:$0xff] %vm251_vm0, %v877_v46  ;;  %v875_v57 = vmax.f32 %v843_v48, 0.0 }
 0x118   : > { %v862_v58 = vmax.f32 %v830_v52, 0.0  ;;  %v828_v61 = vadd.f32 %v1388_v59, %v789_v54  ;;  %891 = vst.msk [vmem:[%s1257_s9 + $0x60] sm:$0xff] %vm251_vm0, %v859_v56 }
 0x119   : > { %v878_v60 = vmax.f32 %v846_v53, 0.0  ;;  %v844_v62 = vadd.f32 %v1388_v59, %v805_v55  ;;  %907 = vst.msk [vmem:[%s1257_s9 + $0xe0] sm:$0xff] %vm251_vm0, %v875_v57 }
 0x11a   : > { %894 = vst.msk [vmem:[%s1257_s9 + $0x78] sm:$0xff] %vm251_vm0, %v862_v58  ;;  %v860_v51 = vmax.f32 %v828_v61, 0.0 }
 0x11b   : > { %910 = vst.msk [vmem:[%s1257_s9 + $0xf8] sm:$0xff] %vm251_vm0, %v878_v60  ;;  %v876_v63 = vmax.f32 %v844_v62, 0.0 }
 0x11c   : > { %892 = vst.msk [vmem:[%s1257_s9 + $0x68] sm:$0xff] %vm251_vm0, %v860_v51 }
 0x11d   : > { %908 = vst.msk [vmem:[%s1257_s9 + $0xe8] sm:$0xff] %vm251_vm0, %v876_v63 }
 0x11e PF: > { %s14_s17 = sadd.s32 1, %s1191_s17   ;;  %s1631_s15 = smov %s1187_s16 }
 0x11f   : > { %p11_p5 = scmp.ge.s32.totalorder %s14_s17, 4   ;;  %s1632_s16 = smov %s1634_s18 }
 0x121   :  { %13 = sbr.rel (!%p11_p5) target bundleno = 2 (0x2), region = 77 }

// kernel: bottleneck_forward.5
= control target key start
LH: loop header
LB: loop body
LE: loop exit
PB: predicated region body
PF: predicated region fallthrough
CT: control target
= control target key end

     0   :  { %10 = vsyncpa [#allocation3], 0  ;;  %s1727_s0 = inlined_call_operand.vmem [shape: bf16[512,32], index: 0, kind: input, shape index: {}]   ;;  %s1728_s1 = inlined_call_operand.vmem [shape: bf16[32,128], index: 1, kind: input, shape index: {}]   ;;  %s1729_s2 = inlined_call_operand.vmem [shape: f32[1,128], index: 2, kind: input, shape index: {}]   ;;  %s1730_s3 = inlined_call_operand.vmem [shape: f32[1,128], index: 3, kind: input, shape index: {}]   ;;  %s1731_s4 = inlined_call_operand.vmem [shape: f32[512,128], index: 4, kind: input, shape index: {}]   ;;  %s1732_s5 = inlined_call_operand.hbm [shape: f32[512,128], index: 5, kind: output, shape index: {}]  }
   0x1   :  { %12 = vsyncpa [#allocation3 + $0x1], 0  ;;  %s1417_s18 = smov 0   ;;  %s1419_s19 = smov 0  }
   0x2   :  { %s1421_s20 = smov 0   ;;  %s1423_s21 = smov 0  }
   0x3   :  { %s1425_s22 = smov 0   ;;  %s1427_s23 = smov 0  }
   0x4 LB: > { %s1119_s24 = sadd.s32 4294967295, %s1382_s23   ;;  %s1120_s25 = sadd.s32 4294967294, %s1382_s23   ;;  %s1382_s23 = sphi %s1427_s23, %s18_s23   ;;  %s1378_s22 = sphi %s1425_s22, %s1739_s22   ;;  %s1374_s21 = sphi %s1423_s21, %s1738_s21   ;;  %s1370_s20 = sphi %s1421_s20, %s1737_s20   ;;  %s1366_s19 = sphi %s1419_s19, %s1736_s19   ;;  %s1362_s18 = sphi %s1417_s18, %s1735_s18  }
   0x5   : > { %s30_s26 = sadd.s32 1, %s1378_s22  ;;  %s159_s27 = sadd.s32 1, %s1370_s20 }
   0x6   : > { %p32_p0 = scmp.ge.s32.totalorder %s30_s26, 2  ;;  %p169_p1 = scmp.ne.s32.totalorder %s1370_s20, %s1366_s19 }
   0x7   : > { %p170_p2 = scmp.eq.s32.totalorder %s1119_s24, 1  ;;  %p175_p3 = scmp.ne.s32.totalorder %s1366_s19, %s1362_s18 }
   0x8   : > { %s1741_s26 = smov (%p32_p0, %s30_s26), 0  ;;  %p176_p5 = scmp.eq.s32.totalorder %s1120_s25, 1 }
   0x9   : > { %p1457_p4 = por %p170_p2, %p169_p1  ;;  %s156_s29 = ssub.s32 %s1378_s22, %s1741_s26 }
   0xa   : > { %p1124_p6 = scmp.ge.s32.totalorder %s1382_s23, 1  ;;  %p157_p7 = scmp.eq.s32.totalorder %s156_s29, 0 }
   0xb   : > { %p1464_p8 = por %p176_p5, %p175_p3  ;;  %p230_p9 = scmp.lt.s32.totalorder %s1382_s23, 3 }
   0xc   : > { %s1470_s6 = scalar_select %p157_p7, %s1370_s20, %s159_s27  }
   0xd   : > { %p231_p10 = pnand %p1124_p6, %p230_p9 }
   0xe   : > { %s1126_s9 = sshll.u32 (!%p231_p10), %s1374_s21, 5  ;;  %s268_s7 = sand.u32 (!%p231_p10), 1, %s1366_s19  }
   0xf   : > { %234 = sbr.rel (%p231_p10) target bundleno = 275 (0x113), region = 40  ;;  %p272_p11 = scmp.lt.s32.totalorder (!%p231_p10), %s1126_s9, 63 }
  0x10   : > { %s1384_s24 = smov (!%p231_p10), [#allocation2]  }
  0x11   : > { %s1310_s25 = sshll.u32 (!%p231_p10), %s1384_s24, 4  ;;  %s1311_s25 = int_to_ptr.vmem [resolvable:$false] %s1310_s25 }
  0x12   : > { %s1312_s27 = scalar_lea.vmem (!%p231_p10), %s1311_s25, 8192 }
  0x14   : > { %v1288_v0 = vld [vmem:[%s1728_s1 + $0x8] sm:$0xff]   ;;  %v1289_v1 = vld [vmem:[%s1728_s1] sm:$0xff]   ;;  %s1743_s9 = smov (!%p272_p11, %s1126_s9), 63  ;;  %vm490_vm0 = vcmask 261120  }
  0x15   : > { %1190 = vmatprep.subr.bf16.mxu0 %v1288_v0  ;;  %1226 = vmatprep.subr.bf16.mxu1 %v1288_v0  ;;  %s1127_s12 = sshll.u32 %s1743_s9, 2  ;;  %s1129_s16 = sshll.u32 %s1743_s9, 3  ;;  %v1523_v19 = vld [vmem:[%s1729_s2] ss:$0 sm:$0xff] }
  0x16   : > { %1191 = vmatpush3.bf16.msra.mxu0 %v1288_v0  ;;  %1228 = vmatpush3.bf16.msra.mxu1 %v1288_v0  ;;  %s1485_s15 = scalar_lea.vmem %s1727_s0, %s1127_s12  ;;  %s1528_s29 = scalar_lea.vmem %s1731_s4, %s1129_s16  ;;  %v1534_v21 = vld [vmem:[%s1730_s3] ss:$0 sm:$0xff] }
  0x17   : > { %1192 = vmatprep.subr.bf16.mxu0 %v1289_v1  ;;  %1227 = vmatprep.subr.bf16.mxu1 %v1289_v1  ;;  %v1290_v2 = vld [vmem:[%s1485_s15] sm:$0xff]   ;;  %v1292_v4 = vld [vmem:[%s1485_s15 + $0x8] sm:$0xff]   ;;  %v1294_v6 = vld [vmem:[%s1485_s15 + $0x10] sm:$0xff]   ;;  %s1541_s9 = sshll.u32 %s268_s7, 8  ;;  %s1171_s12 = sshll.u32 %s1374_s21, 12 }
  0x18   : > { %v1291_v3 = vld [vmem:[%s1485_s15 + $0x40] sm:$0xff]   ;;  %1194 = vmatprep.mubr.msk.bf16.mxu0 %vm490_vm0, %v1290_v2  ;;  %v1293_v5 = vld [vmem:[%s1485_s15 + $0x48] sm:$0xff]   ;;  %v1295_v7 = vld [vmem:[%s1485_s15 + $0x50] sm:$0xff]   ;;  %s1562_s11 = scalar_lea.vmem [#allocation2], %s1541_s9  ;;  %s1673_s16 = scalar_lea.hbm %s1732_s5, %s1171_s12 }
  0x19   : > { %1210 = vmatprep.mubr.msk.bf16.mxu1 %vm490_vm0, %v1291_v3  ;;  %v1296_v8 = vld [vmem:[%s1485_s15 + $0x18] sm:$0xff]   ;;  %v1298_v10 = vld [vmem:[%s1485_s15 + $0x20] sm:$0xff]   ;;  %v1300_v12 = vld [vmem:[%s1485_s15 + $0x28] sm:$0xff]   ;;  %s1019_s13 = sshll.u32 %s1562_s11, 4  ;;  %s1682_s21 = scalar_lea.sflag [#allocation3], %s268_s7  ;;  %s1675_s13 = int_to_ptr.vmem [resolvable:$true] %s1019_s13 }
  0x1a   : > { %1193 = vmatpush3.bf16.msra.mxu0 %v1289_v1  ;;  %1229 = vmatpush3.bf16.msra.mxu1 %v1289_v1  ;;  %v1297_v9 = vld [vmem:[%s1485_s15 + $0x58] sm:$0xff]   ;;  %v1299_v11 = vld [vmem:[%s1485_s15 + $0x60] sm:$0xff]   ;;  %v1301_v13 = vld [vmem:[%s1485_s15 + $0x68] sm:$0xff]   ;;  %s1306_s17 = scalar_lea.vmem %s1675_s13, 4096  ;;  %p1313_p1 = scmp.lt.s32.totalorder %s1675_s13, %s1311_s25 }
  0x1b   : > { %v1302_v14 = vld [vmem:[%s1485_s15 + $0x30] sm:$0xff]   ;;  %v1304_v16 = vld [vmem:[%s1485_s15 + $0x38] sm:$0xff]   ;;  %v877_v33 = vld [vmem:[%s1528_s29] sm:$0xff]  ;;  %p1307_p12 = scmp.ne.s32.totalorder %s1675_s13, %s1306_s17  ;;  %p1314_p2 = scmp.lt.s32.totalorder %s1312_s27, %s1306_s17 }
  0x1c   : > { %v1303_v15 = vld [vmem:[%s1485_s15 + $0x70] sm:$0xff]   ;;  %v1305_v17 = vld [vmem:[%s1485_s15 + $0x78] sm:$0xff]   ;;  %v893_v38 = vld [vmem:[%s1528_s29 + $0x80] sm:$0xff] }
  0x1d   : > { %1195 = vmatmul.mubr.msk.bf16.vlgmr.msra.gmra.mxu0 %vm490_vm0, %v1292_v4  ;;  %1211 = vmatmul.mubr.msk.bf16.vlgmr.msra.gmra.mxu1 %vm490_vm0, %v1293_v5  ;;  %v879_v25 = vld [vmem:[%s1528_s29 + $0x10] sm:$0xff]  ;;  %v880_v43 = vld [vmem:[%s1528_s29 + $0x18] sm:$0xff]  ;;  %v878_v55 = vld [vmem:[%s1528_s29 + $0x8] sm:$0xff]  ;;  %p1308_p13 = pnand %p1307_p12, %p1457_p4  ;;  %p1315_p3 = por %p1314_p2, %p1313_p1 }
  0x1e   : > { %1198 = vmatprep.mubr.msk.bf16.mxu0 %vm490_vm0, %v1294_v6  ;;  %1214 = vmatprep.mubr.msk.bf16.mxu1 %vm490_vm0, %v1295_v7  ;;  %v895_v29 = vld [vmem:[%s1528_s29 + $0x90] sm:$0xff]  ;;  %v896_v49 = vld [vmem:[%s1528_s29 + $0x98] sm:$0xff]  ;;  %v894_v61 = vld [vmem:[%s1528_s29 + $0x88] sm:$0xff] }
  0x1f   : > { %p1309_p0 = pneg %p1308_p13 }
  0x21   : > { %p1316_p5 = pnand %p1315_p3, %p1309_p0 }
  0x25   : > { %1199 = vmatmul.mubr.msk.bf16.gmra.mxu0 %vm490_vm0, %v1296_v8  ;;  %1215 = vmatmul.mubr.msk.bf16.gmra.mxu1 %vm490_vm0, %v1297_v9  ;;  %v883_v9 = vld [vmem:[%s1528_s29 + $0x30] sm:$0xff] }
  0x26   : > { %1202 = vmatprep.mubr.msk.bf16.mxu0 %vm490_vm0, %v1298_v10  ;;  %1218 = vmatprep.mubr.msk.bf16.mxu1 %vm490_vm0, %v1299_v11 }
  0x2d   : > { %1203 = vmatmul.mubr.msk.bf16.gmra.mxu0 %vm490_vm0, %v1300_v12  ;;  %1219 = vmatmul.mubr.msk.bf16.gmra.mxu1 %vm490_vm0, %v1301_v13 }
  0x2e   : > { %1206 = vmatprep.mubr.msk.bf16.mxu0 %vm490_vm0, %v1302_v14  ;;  %1222 = vmatprep.mubr.msk.bf16.mxu1 %vm490_vm0, %v1303_v15  ;;  %v899_v14 = vld [vmem:[%s1528_s29 + $0xb0] sm:$0xff] }
  0x35   : > { %1207 = vmatmul.mubr.msk.bf16.gmra.mxu0 %vm490_vm0, %v1304_v16  ;;  %1223 = vmatmul.mubr.msk.bf16.gmra.mxu1 %vm490_vm0, %v1305_v17 }
  0xdd   : > { %v1196_v18 = vpop.f32.mrf.mxu0  ;;  %v1212_v20 = vpop.f32.mrf.mxu1 }
  0xde   : > { %v808_v23 = vmul.f32 %v1196_v18, %v1523_v19  ;;  %v824_v26 = vmul.f32 %v1212_v20, %v1523_v19  ;;  %v881_v20 = vld [vmem:[%s1528_s29 + $0x20] sm:$0xff] }
  0xdf   : > { %v573_v22 = vpop.f32.mrf.mxu0  ;;  %v637_v24 = vpop.f32.mrf.mxu1 }
  0xe0   : > { %v847_v28 = vadd.f32 %v1534_v21, %v808_v23  ;;  %v806_v30 = vmul.f32 %v1523_v19, %v573_v22  ;;  %v863_v32 = vadd.f32 %v1534_v21, %v824_v26  ;;  %v822_v34 = vmul.f32 %v1523_v19, %v637_v24  ;;  %v897_v26 = vld [vmem:[%s1528_s29 + $0xa0] sm:$0xff] }
  0xe1   : > { %v1197_v27 = vpop.f32.mrf.mxu0  ;;  %v1213_v31 = vpop.f32.mrf.mxu1 }
  0xe2   : > { %v911_v36 = vadd.f32 %v879_v25, %v847_v28  ;;  %v845_v37 = vadd.f32 %v1534_v21, %v806_v30  ;;  %v809_v39 = vmul.f32 %v1197_v27, %v1523_v19  ;;  %v927_v41 = vadd.f32 %v895_v29, %v863_v32 }
  0xe3   : > { %v576_v35 = vpop.f32.mrf.mxu0  ;;  %v640_v40 = vpop.f32.mrf.mxu1  ;;  %v861_v42 = vadd.f32 %v1534_v21, %v822_v34  ;;  %v825_v44 = vmul.f32 %v1213_v31, %v1523_v19  ;;  %v884_v31 = vld [vmem:[%s1528_s29 + $0x38] sm:$0xff] }
  0xe4   : > { %v943_v46 = vmax.f32 %v911_v36, 0.0  ;;  %v909_v47 = vadd.f32 %v877_v33, %v845_v37  ;;  %v848_v48 = vadd.f32 %v1534_v21, %v809_v39  ;;  %v807_v50 = vmul.f32 %v1523_v19, %v576_v35  ;;  %v900_v37 = vld [vmem:[%s1528_s29 + $0xb8] sm:$0xff] }
  0xe5   : > { %v1200_v45 = vpop.f32.mrf.mxu0  ;;  %v1216_v51 = vpop.f32.mrf.mxu1  ;;  %v959_v52 = vmax.f32 %v927_v41, 0.0  ;;  %v925_v53 = vadd.f32 %v893_v38, %v861_v42  ;;  %v864_v54 = vadd.f32 %v1534_v21, %v825_v44  ;;  %v823_v56 = vmul.f32 %v1523_v19, %v640_v40 }
  0xe6   : > { %975 = vst [vmem:[%s1562_s11 + $0x10] sm:$0xff] %v943_v46  ;;  %v941_v58 = vmax.f32 %v909_v47, 0.0  ;;  %v912_v59 = vadd.f32 %v880_v43, %v848_v48  ;;  %v846_v60 = vadd.f32 %v1534_v21, %v807_v50  ;;  %v812_v5 = vmul.f32 %v1200_v45, %v1523_v19  ;;  %v882_v43 = vld [vmem:[%s1528_s29 + $0x28] sm:$0xff] }
  0xe7   : > { %v589_v57 = vpop.f32.mrf.mxu0  ;;  %v653_v62 = vpop.f32.mrf.mxu1  ;;  %991 = vst [vmem:[%s1562_s11 + $0x90] sm:$0xff] %v959_v52  ;;  %v957_v63 = vmax.f32 %v925_v53, 0.0  ;;  %v928_v0 = vadd.f32 %v896_v49, %v864_v54  ;;  %v862_v1 = vadd.f32 %v1534_v21, %v823_v56  ;;  %v828_v10 = vmul.f32 %v1216_v51, %v1523_v19  ;;  %v898_v49 = vld [vmem:[%s1528_s29 + $0xa8] sm:$0xff] }
  0xe8   : > { %973 = vst [vmem:[%s1562_s11] sm:$0xff] %v941_v58  ;;  %v944_v3 = vmax.f32 %v912_v59, 0.0  ;;  %v910_v4 = vadd.f32 %v878_v55, %v846_v60  ;;  %v851_v13 = vadd.f32 %v1534_v21, %v812_v5  ;;  %v810_v15 = vmul.f32 %v1523_v19, %v589_v57 }
  0xe9   : > { %v1201_v2 = vpop.f32.mrf.mxu0  ;;  %v1217_v6 = vpop.f32.mrf.mxu1  ;;  %989 = vst [vmem:[%s1562_s11 + $0x80] sm:$0xff] %v957_v63  ;;  %v960_v7 = vmax.f32 %v928_v0, 0.0  ;;  %v926_v8 = vadd.f32 %v894_v61, %v862_v1  ;;  %v867_v18 = vadd.f32 %v1534_v21, %v828_v10  ;;  %v826_v22 = vmul.f32 %v1523_v19, %v653_v62  ;;  %v887_v61 = vld [vmem:[%s1528_s29 + $0x50] sm:$0xff] }
  0xea   : > { %976 = vst [vmem:[%s1562_s11 + $0x18] sm:$0xff] %v944_v3  ;;  %v942_v12 = vmax.f32 %v910_v4, 0.0  ;;  %v915_v24 = vadd.f32 %v883_v9, %v851_v13  ;;  %v849_v25 = vadd.f32 %v1534_v21, %v810_v15  ;;  %v813_v27 = vmul.f32 %v1201_v2, %v1523_v19  ;;  %v903_v2 = vld [vmem:[%s1528_s29 + $0xd0] sm:$0xff] }
  0xeb   : > { %v592_v11 = vpop.f32.mrf.mxu0  ;;  %v656_v16 = vpop.f32.mrf.mxu1  ;;  %992 = vst [vmem:[%s1562_s11 + $0x98] sm:$0xff] %v960_v7  ;;  %v958_v17 = vmax.f32 %v926_v8, 0.0  ;;  %v931_v29 = vadd.f32 %v899_v14, %v867_v18  ;;  %v865_v30 = vadd.f32 %v1534_v21, %v826_v22  ;;  %v829_v32 = vmul.f32 %v1217_v6, %v1523_v19  ;;  %v885_v7 = vld [vmem:[%s1528_s29 + $0x40] sm:$0xff] }
  0xec   : > { %974 = vst [vmem:[%s1562_s11 + $0x8] sm:$0xff] %v942_v12  ;;  %v947_v34 = vmax.f32 %v915_v24, 0.0  ;;  %v913_v35 = vadd.f32 %v881_v20, %v849_v25  ;;  %v852_v36 = vadd.f32 %v1534_v21, %v813_v27  ;;  %v811_v38 = vmul.f32 %v1523_v19, %v592_v11  ;;  %v901_v12 = vld [vmem:[%s1528_s29 + $0xc0] sm:$0xff]  ;;  %v904_v24 = vld [vmem:[%s1528_s29 + $0xd8] sm:$0xff] }
  0xed   : > { %v1204_v23 = vpop.f32.mrf.mxu0  ;;  %v1220_v28 = vpop.f32.mrf.mxu1  ;;  %990 = vst [vmem:[%s1562_s11 + $0x88] sm:$0xff] %v958_v17  ;;  %v963_v40 = vmax.f32 %v931_v29, 0.0  ;;  %v929_v41 = vadd.f32 %v897_v26, %v865_v30  ;;  %v868_v42 = vadd.f32 %v1534_v21, %v829_v32  ;;  %v827_v44 = vmul.f32 %v1523_v19, %v656_v16  ;;  %v888_v17 = vld [vmem:[%s1528_s29 + $0x58] sm:$0xff]  ;;  %v886_v29 = vld [vmem:[%s1528_s29 + $0x48] sm:$0xff] }
  0xee   : > { %979 = vst [vmem:[%s1562_s11 + $0x30] sm:$0xff] %v947_v34  ;;  %v945_v46 = vmax.f32 %v913_v35, 0.0  ;;  %v916_v47 = vadd.f32 %v884_v31, %v852_v36  ;;  %v850_v48 = vadd.f32 %v1534_v21, %v811_v38  ;;  %v816_v57 = vmul.f32 %v1204_v23, %v1523_v19  ;;  %v902_v35 = vld [vmem:[%s1528_s29 + $0xc8] sm:$0xff] }
  0xef   : > { %v605_v33 = vpop.f32.mrf.mxu0  ;;  %v669_v39 = vpop.f32.mrf.mxu1  ;;  %995 = vst [vmem:[%s1562_s11 + $0xb0] sm:$0xff] %v963_v40  ;;  %v961_v51 = vmax.f32 %v929_v41, 0.0  ;;  %v932_v52 = vadd.f32 %v900_v37, %v868_v42  ;;  %v866_v53 = vadd.f32 %v1534_v21, %v827_v44  ;;  %v832_v62 = vmul.f32 %v1220_v28, %v1523_v19 }
  0xf0   : > { %977 = vst [vmem:[%s1562_s11 + $0x20] sm:$0xff] %v945_v46  ;;  %v948_v55 = vmax.f32 %v916_v47, 0.0  ;;  %v914_v56 = vadd.f32 %v882_v43, %v850_v48  ;;  %v855_v1 = vadd.f32 %v1534_v21, %v816_v57  ;;  %v814_v3 = vmul.f32 %v1523_v19, %v605_v33 }
  0xf1   : > { %v1205_v45 = vpop.f32.mrf.mxu0  ;;  %v1221_v50 = vpop.f32.mrf.mxu1  ;;  %993 = vst [vmem:[%s1562_s11 + $0xa0] sm:$0xff] %v961_v51  ;;  %v964_v59 = vmax.f32 %v932_v52, 0.0  ;;  %v930_v60 = vadd.f32 %v898_v49, %v866_v53  ;;  %v871_v6 = vadd.f32 %v1534_v21, %v832_v62  ;;  %v830_v8 = vmul.f32 %v1523_v19, %v669_v39 }
  0xf2   : > { %980 = vst [vmem:[%s1562_s11 + $0x38] sm:$0xff] %v948_v55  ;;  %v946_v0 = vmax.f32 %v914_v56, 0.0  ;;  %v919_v10 = vadd.f32 %v887_v61, %v855_v1  ;;  %v853_v11 = vadd.f32 %v1534_v21, %v814_v3  ;;  %v817_v13 = vmul.f32 %v1205_v45, %v1523_v19  ;;  %v891_v45 = vld [vmem:[%s1528_s29 + $0x70] sm:$0xff]  ;;  %v889_v55 = vld [vmem:[%s1528_s29 + $0x60] sm:$0xff] }
  0xf3   : > { %v608_v54 = vpop.f32.mrf.mxu0  ;;  %v672_v58 = vpop.f32.mrf.mxu1  ;;  %996 = vst [vmem:[%s1562_s11 + $0xb8] sm:$0xff] %v964_v59  ;;  %v962_v5 = vmax.f32 %v930_v60, 0.0  ;;  %v935_v15 = vadd.f32 %v903_v2, %v871_v6  ;;  %v869_v16 = vadd.f32 %v1534_v21, %v830_v8  ;;  %v833_v18 = vmul.f32 %v1221_v50, %v1523_v19  ;;  %v907_v50 = vld [vmem:[%s1528_s29 + $0xf0] sm:$0xff]  ;;  %v905_v59 = vld [vmem:[%s1528_s29 + $0xe0] sm:$0xff] }
  0xf4   : > { %978 = vst [vmem:[%s1562_s11 + $0x28] sm:$0xff] %v946_v0  ;;  %v951_v20 = vmax.f32 %v919_v10, 0.0  ;;  %v917_v22 = vadd.f32 %v885_v7, %v853_v11  ;;  %v856_v23 = vadd.f32 %v1534_v21, %v817_v13  ;;  %v815_v25 = vmul.f32 %v1523_v19, %v608_v54 }
  0xf5   : > { %v1208_v63 = vpop.f32.mrf.mxu0  ;;  %v1224_v4 = vpop.f32.mrf.mxu1  ;;  %994 = vst [vmem:[%s1562_s11 + $0xa8] sm:$0xff] %v962_v5  ;;  %v967_v26 = vmax.f32 %v935_v15, 0.0  ;;  %v933_v27 = vadd.f32 %v901_v12, %v869_v16  ;;  %v872_v28 = vadd.f32 %v1534_v21, %v833_v18  ;;  %v831_v30 = vmul.f32 %v1523_v19, %v672_v58 }
  0xf6   : > { %983 = vst [vmem:[%s1562_s11 + $0x50] sm:$0xff] %v951_v20  ;;  %v949_v32 = vmax.f32 %v917_v22, 0.0  ;;  %v920_v33 = vadd.f32 %v888_v17, %v856_v23  ;;  %v854_v34 = vadd.f32 %v1534_v21, %v815_v25  ;;  %v820_v42 = vmul.f32 %v1208_v63, %v1523_v19  ;;  %v892_v63 = vld [vmem:[%s1528_s29 + $0x78] sm:$0xff] }
  0xf7   : > { %v621_v9 = vpop.f32.mrf.mxu0  ;;  %v685_v14 = vpop.f32.mrf.mxu1  ;;  %999 = vst [vmem:[%s1562_s11 + $0xd0] sm:$0xff] %v967_v26  ;;  %v965_v37 = vmax.f32 %v933_v27, 0.0  ;;  %v936_v38 = vadd.f32 %v904_v24, %v872_v28  ;;  %v870_v39 = vadd.f32 %v1534_v21, %v831_v30  ;;  %v836_v46 = vmul.f32 %v1224_v4, %v1523_v19  ;;  %v908_v4 = vld [vmem:[%s1528_s29 + $0xf8] sm:$0xff] }
  0xf8   : > { %981 = vst [vmem:[%s1562_s11 + $0x40] sm:$0xff] %v949_v32  ;;  %v952_v40 = vmax.f32 %v920_v33, 0.0  ;;  %v918_v41 = vadd.f32 %v886_v29, %v854_v34  ;;  %v859_v49 = vadd.f32 %v1534_v21, %v820_v42  ;;  %v818_v51 = vmul.f32 %v1523_v19, %v621_v9  ;;  %v890_v9 = vld [vmem:[%s1528_s29 + $0x68] sm:$0xff] }
  0xf9   : > { %v1209_v31 = vpop.f32.mrf.mxu0  ;;  %v1225_v36 = vpop.f32.mrf.mxu1  ;;  %997 = vst [vmem:[%s1562_s11 + $0xc0] sm:$0xff] %v965_v37  ;;  %v968_v43 = vmax.f32 %v936_v38, 0.0  ;;  %v934_v44 = vadd.f32 %v902_v35, %v870_v39  ;;  %v875_v54 = vadd.f32 %v1534_v21, %v836_v46  ;;  %v834_v56 = vmul.f32 %v1523_v19, %v685_v14  ;;  %v906_v14 = vld [vmem:[%s1528_s29 + $0xe8] sm:$0xff] }
  0xfa   : > { %984 = vst [vmem:[%s1562_s11 + $0x58] sm:$0xff] %v952_v40  ;;  %v950_v48 = vmax.f32 %v918_v41, 0.0  ;;  %v923_v57 = vadd.f32 %v891_v45, %v859_v49  ;;  %v857_v58 = vadd.f32 %v1534_v21, %v818_v51  ;;  %v821_v60 = vmul.f32 %v1209_v31, %v1523_v19 }
  0xfb   : > { %v624_v47 = vpop.f32.mrf.mxu0  ;;  %v688_v52 = vpop.f32.mrf.mxu1  ;;  %1000 = vst [vmem:[%s1562_s11 + $0xd8] sm:$0xff] %v968_v43  ;;  %v966_v53 = vmax.f32 %v934_v44, 0.0  ;;  %v939_v61 = vadd.f32 %v907_v50, %v875_v54  ;;  %v873_v62 = vadd.f32 %v1534_v21, %v834_v56  ;;  %v837_v0 = vmul.f32 %v1225_v36, %v1523_v19 }
  0xfc   : > { %982 = vst [vmem:[%s1562_s11 + $0x48] sm:$0xff] %v950_v48  ;;  %v955_v1 = vmax.f32 %v923_v57, 0.0  ;;  %v921_v2 = vadd.f32 %v889_v55, %v857_v58  ;;  %v860_v3 = vadd.f32 %v1534_v21, %v821_v60  ;;  %v819_v5 = vmul.f32 %v1523_v19, %v624_v47 }
  0xfd   : > { %998 = vst [vmem:[%s1562_s11 + $0xc8] sm:$0xff] %v966_v53  ;;  %v971_v6 = vmax.f32 %v939_v61, 0.0  ;;  %v937_v7 = vadd.f32 %v905_v59, %v873_v62  ;;  %v876_v8 = vadd.f32 %v1534_v21, %v837_v0  ;;  %v835_v10 = vmul.f32 %v1523_v19, %v688_v52 }
  0xfe   : > { %987 = vst [vmem:[%s1562_s11 + $0x70] sm:$0xff] %v955_v1  ;;  %v953_v11 = vmax.f32 %v921_v2, 0.0  ;;  %v924_v12 = vadd.f32 %v892_v63, %v860_v3  ;;  %v858_v13 = vadd.f32 %v1534_v21, %v819_v5 }
  0xff   : > { %1003 = vst [vmem:[%s1562_s11 + $0xf0] sm:$0xff] %v971_v6  ;;  %v969_v15 = vmax.f32 %v937_v7, 0.0  ;;  %v940_v16 = vadd.f32 %v908_v4, %v876_v8  ;;  %v874_v17 = vadd.f32 %v1534_v21, %v835_v10 }
 0x100   : > { %985 = vst [vmem:[%s1562_s11 + $0x60] sm:$0xff] %v953_v11  ;;  %v956_v19 = vmax.f32 %v924_v12, 0.0  ;;  %v922_v18 = vadd.f32 %v890_v9, %v858_v13 }
 0x101   : > { %1001 = vst [vmem:[%s1562_s11 + $0xe0] sm:$0xff] %v969_v15  ;;  %v972_v20 = vmax.f32 %v940_v16, 0.0  ;;  %v938_v22 = vadd.f32 %v906_v14, %v874_v17 }
 0x102   : > { %988 = vst [vmem:[%s1562_s11 + $0x78] sm:$0xff] %v956_v19  ;;  %v954_v23 = vmax.f32 %v922_v18, 0.0 }
 0x103   : > { %1004 = vst [vmem:[%s1562_s11 + $0xf8] sm:$0xff] %v972_v20  ;;  %v970_v21 = vmax.f32 %v938_v22, 0.0 }
 0x104   : > { %986 = vst [vmem:[%s1562_s11 + $0x68] sm:$0xff] %v954_v23 }
 0x105   : > { %1002 = vst [vmem:[%s1562_s11 + $0xe8] sm:$0xff] %v970_v21 }
 0x106   : > { %1319 = shalt.err (!%p1316_p5)
}
 0x107   : > { %s1320_s29 = scalar_lea.hbm %s1673_s16, 4096  ;;  %s1324_s10 = scalar_lea.hbm %s1732_s5, 8192 }
 0x108   : > { %p1321_p6 = scmp.ne.s32.totalorder %s1673_s16, %s1320_s29  ;;  %p1325_p10 = scmp.lt.s32.totalorder %s1673_s16, %s1732_s5 }
 0x109   : > { %p1326_p11 = scmp.lt.s32.totalorder %s1324_s10, %s1320_s29 }
 0x10a   : > { %p1322_p7 = pnand %p1321_p6, %p1457_p4 }
 0x10b   : > { %p1327_p12 = por %p1326_p11, %p1325_p10 }
 0x10c   : > { %p1323_p9 = pneg %p1322_p7 }
 0x10e   : > { %p1328_p13 = pnand %p1327_p12, %p1323_p9 }
 0x110   : > { %1331 = shalt.err (!%p1328_p13)
}
 0x111   : > { %s1385_s12 = smov 128   ;;  %s1386_s14 = smov 8  }
 0x112   : > { %1230 = dma.vmem_to_hbm [thread:$0]  (%p1457_p4), %s1675_s13, 4096, %s1673_s16, %s1682_s21, %s1385_s12, %s1385_s12, %s1386_s14  }
 0x113 PF: > { %p1236_p0 = scmp.ge.s32.totalorder %s1382_s23, 2  ;;  %s1034_s15 = sand.u32 1, %s1362_s18  }
 0x114   : > { %s1035_s17 = scalar_lea.sflag [#allocation3], %s1034_s15 }
 0x115   : > { %p1233_p1 = pnand %p1236_p0, %p1464_p8 }
 0x117   : > { %p1234_p2 = pneg %p1233_p1 }
 0x119   : > { %1357 = dma.done.wait (%p1234_p2), %s1035_s17, 4096  }
 0x11a   : > { %1359 = vsyncadd (%p1234_p2), %s1035_s17, 4294963200  ;;  %s18_s23 = sadd.s32 1, %s1382_s23   ;;  %s1735_s18 = smov %s1366_s19 }
 0x11b   : > { %p15_p3 = scmp.ge.s32.totalorder %s18_s23, 4   ;;  %s1736_s19 = smov %s1370_s20 }
 0x11c   : > { %s1737_s20 = smov %s1470_s6  ;;  %s1738_s21 = smov %s1378_s22 }
 0x11d   : > { %s1739_s22 = smov %s1741_s26  ;;  %17 = sbr.rel (!%p15_p3) target bundleno = 4 (0x4), region = 89 }
 0x122   :  { %1040 = vsyncpa [#allocation3], 1 }
 0x123   :  { %1042 = vsyncpa [#allocation3 + $0x1], 1 }

</bundles_post_ra>
